<compile_context>
chip_gen: v5e
topology: v5e:2x2
jax: 0.10.0
libtpu: 0.0.40
codegen_flags: <defaults>
</compile_context>

<pallas_src>
import numpy as np
import jax
import jax.numpy as jnp
from jax.experimental import pallas as pl
from jax.experimental.pallas import tpu as pltpu

NUM_NODES = 159
INPUT_DIM = 2
HIDDEN_DIM = 64
OUTPUT_DIM = 3

N_PAD = 256        # NUM_NODES padded to a multiple of 128
HIDDEN_PAD = 128   # HIDDEN_DIM padded to a full lane width
OUT_PAD = 128      # OUTPUT_DIM padded to a full lane width


def _make_gnn_kernel(rows_per_block):
    """Builds the kernel for a static rows-per-output-block (N_PAD // row_blocks)."""

    def kernel(a_ref, x_ref, w1_ref, b1_ref, w2_ref, b2m_ref, out_ref):
        a = a_ref[...]                                                  # (N_PAD, N_PAD) bf16

        # ---- GCNConv 1: (A_hat @ X) on the MXU, then VPU rank-2 update (K=2) + ReLU ----
        ax = jnp.dot(a, x_ref[...], preferred_element_type=jnp.float32)   # (N_PAD, 2) f32
        h = (ax[:, 0:1] * w1_ref[0:1, :]
             + ax[:, 1:2] * w1_ref[1:2, :]
             + b1_ref[...])                                             # (N_PAD, HIDDEN_PAD)
        h = jnp.maximum(h, 0.0)                                         # ReLU in f32 (VPU)

        # ---- dropout(p=0.5): identity in inference mode ----

        # ---- GCNConv 2: A_hat[rows] @ (H @ W2_pad) + (b2 | -1e30 pad mask) ----
        hz = jnp.dot(h.astype(jnp.bfloat16), w2_ref[...],
                     preferred_element_type=jnp.float32)                # (N_PAD, OUT_PAD) f32
        if rows_per_block == N_PAD:
            a_rows = a
        else:
            r0 = pl.multiple_of(pl.program_id(0) * rows_per_block, rows_per_block)
            a_rows = a_ref[pl.ds(r0, rows_per_block), :]                # (rows, N_PAD) bf16
        z = jnp.dot(a_rows, hz.astype(jnp.bfloat16),
                    preferred_element_type=jnp.float32)                 # (rows, OUT_PAD) f32
        z = z + b2m_ref[...]            # bias on first OUTPUT_DIM lanes, -1e30 on pad lanes

        # ---- masked log_softmax over the first OUTPUT_DIM lanes (f32, EUP) ----
        m = jnp.max(z, axis=-1, keepdims=True)
        s = z - m
        lse = jnp.log(jnp.sum(jnp.exp(s), axis=-1, keepdims=True))      # exp(pad lanes) == 0
        out_ref[...] = s - lse                                          # dense 128-lane store

    return kernel


def simple_gnn_forward(a_p, x_p, w1_p, b1_p, w2_p, b2m_p, *, row_blocks=1):
    """Fused SimpleGNN forward. All inputs pre-padded / pre-cast once at build time.

    a_p:   (N_PAD, N_PAD)          bf16  normalized adjacency (zero padded rows/cols)
    x_p:   (N_PAD, INPUT_DIM)      bf16
    w1_p:  (INPUT_DIM, HIDDEN_PAD) f32   (zero cols >= HIDDEN_DIM)
    b1_p:  (1, HIDDEN_PAD)         f32
    w2_p:  (HIDDEN_PAD, OUT_PAD)   bf16  (zero rows >= HIDDEN_DIM, zero cols >= OUTPUT_DIM)
    b2m_p: (1, OUT_PAD)            f32   b2 on lanes [0, OUTPUT_DIM), -1e30 on pad lanes

    Returns the padded (N_PAD, OUT_PAD) f32 log-prob slab; rows >= NUM_NODES and lanes
    >= OUTPUT_DIM are padding to be masked by the consumer (avoids a post-kernel slice).
    row_blocks=2 splits output rows across a parallel grid axis (both v7x TensorCores).
    """
    assert N_PAD % row_blocks == 0
    rows = N_PAD // row_blocks
    full2d = lambda i: (0, 0)
    cost = pl.CostEstimate(
        flops=25_700_000,          # padded-shape MACs*2 (A@X, rank-2 update, H@W2, A@HZ)
        transcendentals=33_100,    # exp over (256,128) + per-row log
        bytes_accessed=300_000,    # bf16 A/X/W2 + f32 W1/biases + f32 output slab
    )
    return pl.pallas_call(
        _make_gnn_kernel(rows),
        out_shape=jax.ShapeDtypeStruct((N_PAD, OUT_PAD), jnp.float32),
        grid=(row_blocks,),
        in_specs=[
            pl.BlockSpec((N_PAD, N_PAD), full2d),           # A_hat (full for every block)
            pl.BlockSpec((N_PAD, INPUT_DIM), full2d),       # X
            pl.BlockSpec((INPUT_DIM, HIDDEN_PAD), full2d),  # W1 (f32, VPU operand)
            pl.BlockSpec((1, HIDDEN_PAD), full2d),          # b1
            pl.BlockSpec((HIDDEN_PAD, OUT_PAD), full2d),    # W2 (bf16, MXU operand)
            pl.BlockSpec((1, OUT_PAD), full2d),             # b2 + pad mask
        ],
        out_specs=pl.BlockSpec((rows, OUT_PAD), lambda i: (i, 0)),
        compiler_params=pltpu.CompilerParams(dimension_semantics=("parallel",)),
        cost_estimate=cost,
    )(a_p, x_p, w1_p, b1_p, w2_p, b2m_p)


def build_normalized_adjacency_padded(edge_index, num_nodes, n_pad):
    """Dense GCN-normalized adjacency (+ self loops), zero-padded to n_pad, in numpy."""
    src = edge_index[0]
    dst = edge_index[1]
    a = np.zeros((num_nodes, num_nodes), dtype=np.float32)
    a[dst, src] = 1.0                          # messages flow source -> target
    a += np.eye(num_nodes, dtype=np.float32)   # self loops
    deg = a.sum(axis=1)                        # in-degree (incl. self loop)
    d_inv_sqrt = 1.0 / np.sqrt(deg)
    a_hat = d_inv_sqrt[:, None] * a * d_inv_sqrt[None, :]
    a_pad = np.zeros((n_pad, n_pad), dtype=np.float32)
    a_pad[:num_nodes, :num_nodes] = a_hat
    return jnp.asarray(a_pad, dtype=jnp.bfloat16)


def glorot(key, shape):
    fan_in, fan_out = shape
    limit = float(np.sqrt(6.0 / (fan_in + fan_out)))
    return jax.random.uniform(key, shape, jnp.float32, -limit, limit)


if __name__ == "__main__":
    key = jax.random.PRNGKey(0)
    k_x, k_w1, k_w2 = jax.random.split(key, 3)

    # node features (num_nodes, input_dim)
    x = jax.random.normal(k_x, (NUM_NODES, INPUT_DIM), dtype=jnp.float32)

    # fully-connected upper-triangular directed edge list [[i, j] for i < j].T
    edge_index = np.array(
        [[i, j] for i in range(NUM_NODES) for j in range(i + 1, NUM_NODES)],
        dtype=np.int64,
    ).T                                                        # (2, E)

    # ---- one-time padding / casting (no per-forward scatter or slice ops) ----
    a_p = build_normalized_adjacency_padded(edge_index, NUM_NODES, N_PAD)
    x_p = jnp.pad(x, ((0, N_PAD - NUM_NODES), (0, 0))).astype(jnp.bfloat16)

    # deterministic parameter init (glorot weights, zero biases — matches GCNConv init)
    w1 = glorot(k_w1, (INPUT_DIM, HIDDEN_DIM))
    w1_p = jnp.pad(w1, ((0, 0), (0, HIDDEN_PAD - HIDDEN_DIM)))           # f32 (2, 128)
    b1_p = jnp.zeros((1, HIDDEN_PAD), jnp.float32)
    w2 = glorot(k_w2, (HIDDEN_DIM, OUTPUT_DIM))
    w2_p = jnp.pad(w2, ((0, HIDDEN_PAD - HIDDEN_DIM),
                        (0, OUT_PAD - OUTPUT_DIM))).astype(jnp.bfloat16)  # bf16 (128, 128)
    b2 = jnp.zeros((1, OUTPUT_DIM), jnp.float32)
    b2m_p = jnp.concatenate(
        [b2, jnp.full((1, OUT_PAD - OUTPUT_DIM), -1e30, jnp.float32)], axis=1)

    # Single-step path (v5e / v6e default).
    out_slab = jax.block_until_ready(
        simple_gnn_forward(a_p, x_p, w1_p, b1_p, w2_p, b2m_p, row_blocks=1))

    # Row-split parallel-grid path (uses both TensorCores on v7x).
    out_slab2 = jax.block_until_ready(
        simple_gnn_forward(a_p, x_p, w1_p, b1_p, w2_p, b2m_p, row_blocks=2))

    assert out_slab.shape == (N_PAD, OUT_PAD)
    # Test-only slice: consumers of the slab would mask rows >= NUM_NODES / lanes >= 3.
    out = np.asarray(out_slab, np.float32)[:NUM_NODES, :OUTPUT_DIM]
    out2 = np.asarray(out_slab2, np.float32)[:NUM_NODES, :OUTPUT_DIM]

    # log_softmax rows must sum (in prob space) to 1, be finite, and both paths must agree.
    assert np.allclose(np.exp(out).sum(axis=1), 1.0, atol=2e-3)
    assert np.all(np.isfinite(out))
    assert np.allclose(out2, out, atol=1e-3, rtol=1e-3)
    print("KERNEL_OK")
</pallas_src>

<mosaic_0001>
module attributes {stable_mosaic.version = 11 : i64} {
  func.func @kernel(%arg0: i32, %arg1: memref<256x256xbf16, #tpu.memory_space<vmem>>, %arg2: memref<256x2xbf16, #tpu.memory_space<vmem>>, %arg3: memref<2x128xf32, #tpu.memory_space<vmem>>, %arg4: memref<1x128xf32, #tpu.memory_space<vmem>>, %arg5: memref<128x128xbf16, #tpu.memory_space<vmem>>, %arg6: memref<1x128xf32, #tpu.memory_space<vmem>>, %arg7: memref<256x128xf32, #tpu.memory_space<vmem>>) attributes {dimension_semantics = [#tpu.dimension_semantics<parallel>], iteration_bounds = array<i64: 1>, scalar_prefetch = 0 : i64, scratch_operands = 0 : i64, tpu.core_type = #tpu.core_type<tc>, window_params = [{pipeline_mode = #tpu.pipeline_mode<synchronous>, transform_indices = @transform_0, window_bounds = array<i64: 256, 256>}, {pipeline_mode = #tpu.pipeline_mode<synchronous>, transform_indices = @transform_1, window_bounds = array<i64: 256, 2>}, {pipeline_mode = #tpu.pipeline_mode<synchronous>, transform_indices = @transform_2, window_bounds = array<i64: 2, 128>}, {pipeline_mode = #tpu.pipeline_mode<synchronous>, transform_indices = @transform_3, window_bounds = array<i64: 1, 128>}, {pipeline_mode = #tpu.pipeline_mode<synchronous>, transform_indices = @transform_4, window_bounds = array<i64: 128, 128>}, {pipeline_mode = #tpu.pipeline_mode<synchronous>, transform_indices = @transform_5, window_bounds = array<i64: 1, 128>}, {transform_indices = @transform_6, window_bounds = array<i64: 256, 128>}]} {
    %c0 = arith.constant 0 : index
    %c0_0 = arith.constant 0 : index
    %0 = vector.load %arg1[%c0, %c0_0] : memref<256x256xbf16, #tpu.memory_space<vmem>>, vector<256x256xbf16>
    %c0_1 = arith.constant 0 : index
    %c0_2 = arith.constant 0 : index
    %1 = vector.load %arg2[%c0_1, %c0_2] : memref<256x2xbf16, #tpu.memory_space<vmem>>, vector<256x2xbf16>
    %cst = arith.constant dense<0.000000e+00> : vector<256x2xf32>
    %2 = tpu.matmul %0, %1, %cst {dimension_numbers = #tpu.dot_dimension_numbers<[1], [0], [0], [1], [0, 0, 1, 1], [], []>} : vector<256x256xbf16>, vector<256x2xbf16>, vector<256x2xf32> -> vector<256x2xf32>
    %3 = vector.extract_strided_slice %2 {offsets = [0, 0], sizes = [256, 1], strides = [1, 1]} : vector<256x2xf32> to vector<256x1xf32>
    %c0_3 = arith.constant 0 : index
    %c0_4 = arith.constant 0 : index
    %4 = vector.load %arg3[%c0_3, %c0_4] : memref<2x128xf32, #tpu.memory_space<vmem>>, vector<1x128xf32>
    %5 = vector.broadcast %3 : vector<256x1xf32> to vector<256x128xf32>
    %6 = vector.broadcast %4 : vector<1x128xf32> to vector<256x128xf32>
    %7 = arith.mulf %5, %6 : vector<256x128xf32>
    %8 = vector.extract_strided_slice %2 {offsets = [0, 1], sizes = [256, 1], strides = [1, 1]} : vector<256x2xf32> to vector<256x1xf32>
    %c1 = arith.constant 1 : index
    %c0_5 = arith.constant 0 : index
    %9 = vector.load %arg3[%c1, %c0_5] : memref<2x128xf32, #tpu.memory_space<vmem>>, vector<1x128xf32>
    %10 = vector.broadcast %8 : vector<256x1xf32> to vector<256x128xf32>
    %11 = vector.broadcast %9 : vector<1x128xf32> to vector<256x128xf32>
    %12 = arith.mulf %10, %11 : vector<256x128xf32>
    %13 = arith.addf %7, %12 : vector<256x128xf32>
    %c0_6 = arith.constant 0 : index
    %c0_7 = arith.constant 0 : index
    %14 = vector.load %arg4[%c0_6, %c0_7] : memref<1x128xf32, #tpu.memory_space<vmem>>, vector<1x128xf32>
    %15 = vector.broadcast %14 : vector<1x128xf32> to vector<256x128xf32>
    %16 = arith.addf %13, %15 : vector<256x128xf32>
    %cst_8 = arith.constant 0.000000e+00 : f32
    %17 = vector.broadcast %cst_8 : f32 to vector<256x128xf32>
    %18 = arith.maximumf %16, %17 : vector<256x128xf32>
    %19 = arith.truncf %18 : vector<256x128xf32> to vector<256x128xbf16>
    %c0_9 = arith.constant 0 : index
    %c0_10 = arith.constant 0 : index
    %20 = vector.load %arg5[%c0_9, %c0_10] : memref<128x128xbf16, #tpu.memory_space<vmem>>, vector<128x128xbf16>
    %cst_11 = arith.constant dense<0.000000e+00> : vector<256x128xf32>
    %21 = tpu.matmul %19, %20, %cst_11 {dimension_numbers = #tpu.dot_dimension_numbers<[1], [0], [0], [1], [0, 0, 1, 1], [], []>} : vector<256x128xbf16>, vector<128x128xbf16>, vector<256x128xf32> -> vector<256x128xf32>
    %22 = arith.truncf %21 : vector<256x128xf32> to vector<256x128xbf16>
    %cst_12 = arith.constant dense<0.000000e+00> : vector<256x128xf32>
    %23 = tpu.matmul %0, %22, %cst_12 {dimension_numbers = #tpu.dot_dimension_numbers<[1], [0], [0], [1], [0, 0, 1, 1], [], []>} : vector<256x256xbf16>, vector<256x128xbf16>, vector<256x128xf32> -> vector<256x128xf32>
    %c0_13 = arith.constant 0 : index
    %c0_14 = arith.constant 0 : index
    %24 = vector.load %arg6[%c0_13, %c0_14] : memref<1x128xf32, #tpu.memory_space<vmem>>, vector<1x128xf32>
    %25 = vector.broadcast %24 : vector<1x128xf32> to vector<256x128xf32>
    %26 = arith.addf %23, %25 : vector<256x128xf32>
    %cst_15 = arith.constant dense<0xFF800000> : vector<256xf32>
    %27 = vector.multi_reduction <maximumf>, %26, %cst_15 [1] : vector<256x128xf32> to vector<256xf32>
    %28 = vector.shape_cast %27 : vector<256xf32> to vector<256x1xf32>
    %29 = vector.broadcast %28 : vector<256x1xf32> to vector<256x128xf32>
    %30 = arith.subf %26, %29 : vector<256x128xf32>
    %31 = math.exp %30 : vector<256x128xf32>
    %cst_16 = arith.constant dense<0.000000e+00> : vector<256xf32>
    %32 = vector.multi_reduction <add>, %31, %cst_16 [1] : vector<256x128xf32> to vector<256xf32>
    %33 = vector.shape_cast %32 : vector<256xf32> to vector<256x1xf32>
    %34 = math.log %33 : vector<256x1xf32>
    %35 = vector.broadcast %34 : vector<256x1xf32> to vector<256x128xf32>
    %36 = arith.subf %30, %35 : vector<256x128xf32>
    %c0_17 = arith.constant 0 : index
    %c0_18 = arith.constant 0 : index
    %37 = vector.load %arg7[%c0_17, %c0_18] : memref<256x128xf32, #tpu.memory_space<vmem>>, vector<256x128xf32>
    tpu.vector_store %arg7[%c0_17, %c0_18], %36 {strides = array<i32>} : memref<256x128xf32, #tpu.memory_space<vmem>>, vector<256x128xf32>,
    return
  }
  func.func @transform_0(%arg0: i32) -> (i32, i32) {
    %c0_i32 = arith.constant 0 : i32
    %c0_i32_0 = arith.constant 0 : i32
    %c0_i32_1 = arith.constant 0 : i32
    return %c0_i32, %c0_i32_0 : i32, i32
  }
  func.func @transform_1(%arg0: i32) -> (i32, i32) {
    %c0_i32 = arith.constant 0 : i32
    %c0_i32_0 = arith.constant 0 : i32
    %c0_i32_1 = arith.constant 0 : i32
    return %c0_i32, %c0_i32_0 : i32, i32
  }
  func.func @transform_2(%arg0: i32) -> (i32, i32) {
    %c0_i32 = arith.constant 0 : i32
    %c0_i32_0 = arith.constant 0 : i32
    %c0_i32_1 = arith.constant 0 : i32
    return %c0_i32, %c0_i32_0 : i32, i32
  }
  func.func @transform_3(%arg0: i32) -> (i32, i32) {
    %c0_i32 = arith.constant 0 : i32
    %c0_i32_0 = arith.constant 0 : i32
    %c0_i32_1 = arith.constant 0 : i32
    return %c0_i32, %c0_i32_0 : i32, i32
  }
  func.func @transform_4(%arg0: i32) -> (i32, i32) {
    %c0_i32 = arith.constant 0 : i32
    %c0_i32_0 = arith.constant 0 : i32
    %c0_i32_1 = arith.constant 0 : i32
    return %c0_i32, %c0_i32_0 : i32, i32
  }
  func.func @transform_5(%arg0: i32) -> (i32, i32) {
    %c0_i32 = arith.constant 0 : i32
    %c0_i32_0 = arith.constant 0 : i32
    %c0_i32_1 = arith.constant 0 : i32
    return %c0_i32, %c0_i32_0 : i32, i32
  }
  func.func @transform_6(%arg0: i32) -> (i32, i32) {
    %c0_i32 = arith.constant 0 : i32
    %c0_i32_0 = arith.constant 0 : i32
    return %arg0, %c0_i32 : i32, i32
  }
}

</mosaic_0001>

<bundles_post_ra>
// kernel: tpu_custom_call.1
= control target key start
LH: loop header
LB: loop body
LE: loop exit
PB: predicated region body
PF: predicated region fallthrough
CT: control target
= control target key end

     0   :  { %11 = vsyncpa [#allocation3], 0  ;;  %s3019_s0 = inlined_call_operand.hbm [shape: bf16[256,256], index: 0, kind: input, shape index: {}]   ;;  %s3020_s1 = inlined_call_operand.vmem [shape: bf16[256,2], index: 1, kind: input, shape index: {}]   ;;  %s3021_s2 = inlined_call_operand.vmem [shape: f32[2,128], index: 2, kind: input, shape index: {}]   ;;  %s3022_s3 = inlined_call_operand.vmem [shape: f32[1,128], index: 3, kind: input, shape index: {}]   ;;  %s3023_s4 = inlined_call_operand.vmem [shape: bf16[128,128], index: 4, kind: input, shape index: {}]   ;;  %s3024_s5 = inlined_call_operand.vmem [shape: f32[1,128], index: 5, kind: input, shape index: {}]   ;;  %s3025_s6 = inlined_call_operand.hbm [shape: f32[256,128], index: 6, kind: output, shape index: {}]  }
   0x1   :  { %12 = vsyncpa [#allocation4], 0  ;;  %s17_s23 = sshll.u32 %s3019_s0, 4  ;;  %s2264_s24 = smov [#allocation2]   ;;  %s18_s23 = int_to_ptr.hbm [resolvable:$true] %s17_s23 }
   0x2   :  { %s19_s25 = sshll.u32 %s2264_s24, 4  ;;  %s2265_s26 = smov 128   ;;  %s20_s25 = int_to_ptr.vmem [resolvable:$true] %s19_s25 }
   0x3   :  { %s2266_s27 = smov 8  }
   0x4   :  { %25 = dma.hbm_to_vmem [thread:$0]  %s18_s23, 4096, %s20_s25, [#allocation3], %s2265_s26, %s2265_s26, %s2266_s27  }
   0x5   :  { %2260 = dma.done.wait [#allocation3], 4096  }
   0x6   :  { %2261 = vsyncadd [#allocation3], 4294963200  ;;  %v1995_v0 = vld [vmem:[%s3020_s1 + $0x38] sm:$0xff]  ;;  %v1994_v1 = vld [vmem:[%s3020_s1 + $0x30] sm:$0xff] }
   0x7   :  { %2012 = vmatpush.bf16.msra.mxu1 %v1995_v0  ;;  %360 = vmatpush.bf16.msra.mxu0 %v1995_v0  ;;  %v1993_v2 = vld [vmem:[%s3020_s1 + $0x28] sm:$0xff]  ;;  %v1992_v3 = vld [vmem:[%s3020_s1 + $0x20] sm:$0xff]  ;;  %v1991_v4 = vld [vmem:[%s3020_s1 + $0x18] sm:$0xff] }
   0x8   :  { %2013 = vmatpush.bf16.msra.mxu2 %v1995_v0  ;;  %2014 = vmatpush.bf16.msra.mxu3 %v1995_v0  ;;  %v1990_v5 = vld [vmem:[%s3020_s1 + $0x10] sm:$0xff]  ;;  %v1989_v6 = vld [vmem:[%s3020_s1 + $0x8] sm:$0xff]  ;;  %v1988_v7 = vld [vmem:[%s3020_s1] sm:$0xff] }
   0x9   :  { %v1766_v8 = vld [vmem:[#allocation2 + $0x40] sm:$0xf]  ;;  %v1965_v9 = vld [vmem:[#allocation2 + $0x44] sm:$0xf0]  ;;  %v2003_v11 = vld [vmem:[%s3020_s1 + $0x78] sm:$0xff] }
   0xa   :  { %v2335_v10 = vor.u32 %v1965_v9, %v1766_v8  ;;  %v2002_v12 = vld [vmem:[%s3020_s1 + $0x70] sm:$0xff]  ;;  %v2001_v13 = vld [vmem:[%s3020_s1 + $0x68] sm:$0xff]  ;;  %v1967_v15 = vld [vmem:[#allocation2 + $0x54] sm:$0xf0] }
   0xb   :  { %2015 = vmatpush.bf16.msra.mxu1 %v1994_v1  ;;  %361 = vmatpush.bf16.msra.mxu0 %v1994_v1  ;;  %v1774_v14 = vld [vmem:[#allocation2 + $0x50] sm:$0xf]  ;;  %v2000_v16 = vld [vmem:[%s3020_s1 + $0x60] sm:$0xff]  ;;  %v1999_v18 = vld [vmem:[%s3020_s1 + $0x58] sm:$0xff] }
   0xc   :  { %2016 = vmatpush.bf16.msra.mxu2 %v1994_v1  ;;  %2017 = vmatpush.bf16.msra.mxu3 %v1994_v1  ;;  %v2350_v17 = vor.u32 %v1967_v15, %v1774_v14  ;;  %v1734_v19 = vld [vmem:[#allocation2] sm:$0xf]  ;;  %v1957_v20 = vld [vmem:[#allocation2 + $0x4] sm:$0xf0]  ;;  %v1998_v21 = vld [vmem:[%s3020_s1 + $0x50] sm:$0xff] }
   0xd   :  { %v2359_v22 = vor.u32 %v1957_v20, %v1734_v19  ;;  %v1997_v23 = vld [vmem:[%s3020_s1 + $0x48] sm:$0xff]  ;;  %v1782_v24 = vld [vmem:[#allocation2 + $0x60] sm:$0xf]  ;;  %v1742_v28 = vld [vmem:[#allocation2 + $0x10] sm:$0xf] }
   0xe   :  { %v1969_v25 = vld [vmem:[#allocation2 + $0x64] sm:$0xf0]  ;;  %v1996_v26 = vld [vmem:[%s3020_s1 + $0x40] sm:$0xff]  ;;  %v1959_v29 = vld [vmem:[#allocation2 + $0x14] sm:$0xf0]  ;;  %s1719_s1 = sshll.u32 %s3025_s6, 4  ;;  %s1720_s1 = int_to_ptr.hbm [resolvable:$true] %s1719_s1 }
   0xf   :  { %2018 = vmatpush.bf16.msra.mxu1 %v1993_v2  ;;  %362 = vmatpush.bf16.msra.mxu0 %v1993_v2  ;;  %v2368_v27 = vor.u32 %v1969_v25, %v1782_v24  ;;  %v2371_v30 = vor.u32 %v1959_v29, %v1742_v28  ;;  %v1790_v31 = vld [vmem:[#allocation2 + $0x70] sm:$0xf]  ;;  %v1971_v32 = vld [vmem:[#allocation2 + $0x74] sm:$0xf0]  ;;  %v1750_v34 = vld [vmem:[#allocation2 + $0x20] sm:$0xf] }
  0x10   :  { %2019 = vmatpush.bf16.msra.mxu2 %v1993_v2  ;;  %2020 = vmatpush.bf16.msra.mxu3 %v1993_v2  ;;  %v2374_v33 = vor.u32 %v1971_v32, %v1790_v31  ;;  %v1961_v35 = vld [vmem:[#allocation2 + $0x24] sm:$0xf0]  ;;  %v1956_v37 = vld [vmem:[#allocation2 + $0x4] sm:$0xf]  ;;  %v1736_v38 = vld [vmem:[#allocation2 + $0x8] sm:$0xf0] }
  0x11   :  { %v2377_v36 = vor.u32 %v1961_v35, %v1750_v34  ;;  %v2380_v39 = vor.u32 %v1956_v37, %v1736_v38  ;;  %v1758_v40 = vld [vmem:[#allocation2 + $0x30] sm:$0xf]  ;;  %v1963_v41 = vld [vmem:[#allocation2 + $0x34] sm:$0xf0]  ;;  %v1958_v43 = vld [vmem:[#allocation2 + $0x14] sm:$0xf] }
  0x12   :  { %v2383_v42 = vor.u32 %v1963_v41, %v1758_v40  ;;  %v1744_v44 = vld [vmem:[#allocation2 + $0x18] sm:$0xf0]  ;;  %v1960_v46 = vld [vmem:[#allocation2 + $0x24] sm:$0xf]  ;;  %v1752_v47 = vld [vmem:[#allocation2 + $0x28] sm:$0xf0] }
  0x13   :  { %2021 = vmatpush.bf16.msra.mxu1 %v1992_v3  ;;  %363 = vmatpush.bf16.msra.mxu0 %v1992_v3  ;;  %v2386_v45 = vor.u32 %v1958_v43, %v1744_v44  ;;  %v2389_v48 = vor.u32 %v1960_v46, %v1752_v47  ;;  %v1962_v49 = vld [vmem:[#allocation2 + $0x34] sm:$0xf]  ;;  %v1760_v50 = vld [vmem:[#allocation2 + $0x38] sm:$0xf0]  ;;  %v1964_v52 = vld [vmem:[#allocation2 + $0x44] sm:$0xf] }
  0x14   :  { %2022 = vmatpush.bf16.msra.mxu2 %v1992_v3  ;;  %2023 = vmatpush.bf16.msra.mxu3 %v1992_v3  ;;  %v2392_v51 = vor.u32 %v1962_v49, %v1760_v50  ;;  %v1768_v53 = vld [vmem:[#allocation2 + $0x48] sm:$0xf0]  ;;  %v1966_v57 = vld [vmem:[#allocation2 + $0x54] sm:$0xf]  ;;  %v1776_v58 = vld [vmem:[#allocation2 + $0x58] sm:$0xf0] }
  0x15   :  { %v2395_v54 = vor.u32 %v1964_v52, %v1768_v53  ;;  %v2402_v59 = vor.u32 %v1966_v57, %v1776_v58  ;;  %v1798_v61 = vld [vmem:[#allocation2 + $0x80] sm:$0xf]  ;;  %v1973_v62 = vld [vmem:[#allocation2 + $0x84] sm:$0xf0]  ;;  %v1968_v1 = vld [vmem:[#allocation2 + $0x64] sm:$0xf] }
  0x16   :  { %v2407_v63 = vor.u32 %v1973_v62, %v1798_v61  ;;  %v1784_v2 = vld [vmem:[#allocation2 + $0x68] sm:$0xf0]  ;;  %v1975_v8 = vld [vmem:[#allocation2 + $0x94] sm:$0xf0]  ;;  %v1977_v19 = vld [vmem:[#allocation2 + $0xa4] sm:$0xf0] }
  0x17   :  { %2024 = vmatpush.bf16.msra.mxu1 %v1991_v4  ;;  %364 = vmatpush.bf16.msra.mxu0 %v1991_v4  ;;  %v2412_v3 = vor.u32 %v1968_v1, %v1784_v2  ;;  %v1972_v24 = vld [vmem:[#allocation2 + $0x84] sm:$0xf]  ;;  %v1800_v25 = vld [vmem:[#allocation2 + $0x88] sm:$0xf0]  ;;  %v1822_v31 = vld [vmem:[#allocation2 + $0xb0] sm:$0xf] }
  0x18   :  { %2025 = vmatpush.bf16.msra.mxu2 %v1991_v4  ;;  %2026 = vmatpush.bf16.msra.mxu3 %v1991_v4  ;;  %v1979_v32 = vld [vmem:[#allocation2 + $0xb4] sm:$0xf0]  ;;  %v1974_v40 = vld [vmem:[#allocation2 + $0x94] sm:$0xf]  ;;  %v1808_v41 = vld [vmem:[#allocation2 + $0x98] sm:$0xf0] }
  0x19   :  { %v2438_v34 = vor.u32 %v1979_v32, %v1822_v31  ;;  %v2441_v43 = vor.u32 %v1974_v40, %v1808_v41  ;;  %v1830_v49 = vld [vmem:[#allocation2 + $0xc0] sm:$0xf]  ;;  %v1981_v50 = vld [vmem:[#allocation2 + $0xc4] sm:$0xf0]  ;;  %v1976_v61 = vld [vmem:[#allocation2 + $0xa4] sm:$0xf] }
  0x1a   :  { %v2445_v52 = vor.u32 %v1981_v50, %v1830_v49  ;;  %v1816_v62 = vld [vmem:[#allocation2 + $0xa8] sm:$0xf0]  ;;  %v1846_v32 = vld [vmem:[#allocation2 + $0xe0] sm:$0xf] }
  0x1b   :  { %2027 = vmatpush.bf16.msra.mxu1 %v1990_v5  ;;  %365 = vmatpush.bf16.msra.mxu0 %v1990_v5  ;;  %v2448_v1 = vor.u32 %v1976_v61, %v1816_v62  ;;  %v2011_v62 = vld [vmem:[%s3023_s4 + $0x38] sm:$0xff] }
  0x1c   :  { %2028 = vmatpush.bf16.msra.mxu2 %v1990_v5  ;;  %2029 = vmatpush.bf16.msra.mxu3 %v1990_v5  ;;  %v2267_v5 = vmov 1  }
  0x1d   :  { %2043 = vset.pattern.permute.xlu1 %v2267_v5 }
  0x1f   :  { %2030 = vmatpush.bf16.msra.mxu1 %v1989_v6  ;;  %366 = vmatpush.bf16.msra.mxu0 %v1989_v6 }
  0x20   :  { %2031 = vmatpush.bf16.msra.mxu2 %v1989_v6  ;;  %2032 = vmatpush.bf16.msra.mxu3 %v1989_v6  ;;  %v2268_v6 = vmov 0  }
  0x21   :  { %2042 = vset.pattern.permute.xlu0 %v2268_v6  ;;  %2044 = vset.pattern.permute.xlu2 %v2268_v6 }
  0x23   :  { %2033 = vmatpush.bf16.msra.mxu1 %v1988_v7  ;;  %367 = vmatpush.bf16.msra.mxu0 %v1988_v7 }
  0x24   :  { %2034 = vmatpush.bf16.msra.mxu2 %v1988_v7  ;;  %2035 = vmatpush.bf16.msra.mxu3 %v1988_v7  ;;  %v1806_v7 = vld [vmem:[#allocation2 + $0x90] sm:$0xf] }
  0x25   :  { %v2420_v9 = vor.u32 %v1975_v8, %v1806_v7  ;;  %v1838_v8 = vld [vmem:[#allocation2 + $0xd0] sm:$0xf] }
  0x26   :  { %388 = vmatmul.bf16.vlgmr.msra.gmra.mxu1 %v2335_v10  ;;  %368 = vmatmul.bf16.vlgmr.msra.gmra.mxu0 %v2359_v22 }
  0x27   :  { %449 = vmatpush.bf16.msrb.mxu1 %v2003_v11  ;;  %408 = vmatmul.bf16.vlgmr.msra.gmra.mxu2 %v2407_v63 }
  0x28   :  { %428 = vmatmul.bf16.vlgmr.msra.gmra.mxu3 %v2445_v52  ;;  %1074 = vmatpush.bf16.msrb.mxu2 %v2011_v62 }
  0x2b   :  { %450 = vmatpush.bf16.msrb.mxu1 %v2002_v12  ;;  %v1970_v12 = vld [vmem:[#allocation2 + $0x74] sm:$0xf] }
  0x2f   :  { %451 = vmatpush.bf16.msrb.mxu1 %v2001_v13  ;;  %v1792_v13 = vld [vmem:[#allocation2 + $0x78] sm:$0xf0] }
  0x30   :  { %v2425_v14 = vor.u32 %v1970_v12, %v1792_v13  ;;  %v1983_v12 = vld [vmem:[#allocation2 + $0xd4] sm:$0xf0] }
  0x33   :  { %452 = vmatpush.bf16.msrb.mxu1 %v2000_v16 }
  0x36   :  { %393 = vmatmul.bf16.gmra.mxu1 %v2350_v17  ;;  %373 = vmatmul.bf16.gmra.mxu0 %v2371_v30 }
  0x37   :  { %453 = vmatpush.bf16.msrb.mxu1 %v1999_v18  ;;  %413 = vmatmul.bf16.gmra.mxu2 %v2420_v9  ;;  %v1814_v18 = vld [vmem:[#allocation2 + $0xa0] sm:$0xf] }
  0x38   :  { %v2430_v20 = vor.u32 %v1977_v19, %v1814_v18 }
  0x3b   :  { %454 = vmatpush.bf16.msrb.mxu1 %v1998_v21 }
  0x3f   :  { %455 = vmatpush.bf16.msrb.mxu1 %v1997_v23 }
  0x43   :  { %456 = vmatpush.bf16.msrb.mxu1 %v1996_v26  ;;  %v2435_v26 = vor.u32 %v1972_v24, %v1800_v25  ;;  %v1824_v24 = vld [vmem:[#allocation2 + $0xb8] sm:$0xf0] }
  0x46   :  { %398 = vmatmul.bf16.gmra.mxu1 %v2368_v27  ;;  %378 = vmatmul.bf16.gmra.mxu0 %v2377_v36 }
  0x47   :  { %418 = vmatmul.bf16.gmra.mxu2 %v2430_v20 }
  0x56   :  { %403 = vmatmul.bf16.gmra.mxu1 %v2374_v33  ;;  %383 = vmatmul.bf16.gmra.mxu0 %v2383_v42 }
  0x57   :  { %423 = vmatmul.bf16.gmra.mxu2 %v2438_v34 }
  0x66   :  { %457 = vmatmul.bf16.vlgmr.msrb.gmra.mxu1 %v2380_v39 }
  0x76   :  { %462 = vmatmul.bf16.gmra.mxu1 %v2386_v45 }
  0x86   :  { %467 = vmatmul.bf16.gmra.mxu1 %v2389_v48 }
  0x96   :  { %472 = vmatmul.bf16.gmra.mxu1 %v2392_v51 }
  0xa3   :  { %v2397_v55 = vpop.f32.mrf.mxu1  ;;  %v369_v16 = vpop.f32.mrf.mxu0 }
  0xa6   :  { %477 = vmatmul.bf16.gmra.mxu1 %v2395_v54 }
  0xab   :  { %v2400_v56 = vpop.f32.mrf.mxu1  ;;  %v371_v23 = vpop.f32.mrf.mxu0 }
  0xb3   :  { %v2404_v60 = vpop.f32.mrf.mxu1  ;;  %v374_v35 = vpop.f32.mrf.mxu0 }
  0xb6   :  { %482 = vmatmul.bf16.gmra.mxu1 %v2402_v59 }
  0xbb   :  { %v2410_v0 = vpop.f32.mrf.mxu1  ;;  %v376_v44 = vpop.f32.mrf.mxu0 }
  0xc3   :  { %v2414_v4 = vpop.f32.mrf.mxu1  ;;  %v379_v58 = vpop.f32.mrf.mxu0 }
  0xc6   :  { %487 = vmatmul.bf16.gmra.mxu1 %v2412_v3 }
  0xcb   :  { %v2423_v11 = vpop.f32.mrf.mxu1  ;;  %v381_v13 = vpop.f32.mrf.mxu0 }
  0xd3   :  { %v2427_v15 = vpop.f32.mrf.mxu1  ;;  %v384_v25 = vpop.f32.mrf.mxu0 }
  0xd6   :  { %492 = vmatmul.bf16.gmra.mxu1 %v2425_v14 }
  0xdb   :  { %v2433_v21 = vpop.f32.mrf.mxu1 }
  0xe3   :  { %v458_v28 = vpop.f32.mrf.mxu1 }
  0xe4   :  { %v459_v29 = vadd.f32 %v458_v28, %v369_v16  ;;  %v2452_v16 = vor.u32 %v1983_v12, %v1838_v8  ;;  %v2010_v8 = vld [vmem:[%s3023_s4 + $0x30] sm:$0xff] }
  0xe5   :  { %1075 = vmatpush.bf16.msrb.mxu2 %v2010_v8 }
  0xe6   :  { %497 = vmatmul.bf16.gmra.mxu1 %v2435_v26  ;;  %734 = vperm.xlu1 %2043, %v459_v29  }
  0xe7   :  { %541 = vperm.xlu0 %2042, %v459_v29   ;;  %433 = vmatmul.bf16.gmra.mxu3 %v2452_v16 }
  0xeb   :  { %v460_v37 = vpop.f32.mrf.mxu1 }
  0xec   :  { %v461_v38 = vadd.f32 %v460_v37, %v371_v23  ;;  %v1978_v23 = vld [vmem:[#allocation2 + $0xb4] sm:$0xf] }
  0xed   :  { %v2456_v28 = vor.u32 %v1978_v23, %v1824_v24  ;;  %v2007_v24 = vld [vmem:[%s3023_s4 + $0x18] sm:$0xff] }
  0xee   :  { %738 = vperm.xlu1 %2043, %v461_v38  }
  0xef   :  { %546 = vperm.xlu0 %2042, %v461_v38   ;;  %v386_v38 = vpop.f32.mrf.mxu0 }
  0xf3   :  { %v463_v46 = vpop.f32.mrf.mxu1 }
  0xf4   :  { %v464_v47 = vadd.f32 %v463_v46, %v374_v35  ;;  %v1985_v35 = vld [vmem:[#allocation2 + $0xe4] sm:$0xf0]  ;;  %v1832_v46 = vld [vmem:[#allocation2 + $0xc8] sm:$0xf0] }
  0xf5   :  { %v2460_v37 = vor.u32 %v1985_v35, %v1846_v32 }
  0xf6   :  { %502 = vmatmul.bf16.gmra.mxu1 %v2441_v43  ;;  %551 = vperm.xlu2 %2044, %v464_v47  }
  0xf7   :  { %2045 = vset.pattern.permute.xlu0 %v2267_v5  ;;  %438 = vmatmul.bf16.gmra.mxu3 %v2460_v37 }
  0xf8   :  { %742 = vperm.xlu0 %2045, %v464_v47  }
  0xfb   :  { %v465_v53 = vpop.f32.mrf.mxu1 }
  0xfc   :  { %v466_v57 = vadd.f32 %v465_v53, %v376_v44  ;;  %v1980_v44 = vld [vmem:[#allocation2 + $0xc4] sm:$0xf]  ;;  %v1854_v53 = vld [vmem:[#allocation2 + $0xf0] sm:$0xf] }
  0xfd   :  { %v2465_v47 = vor.u32 %v1980_v44, %v1832_v46  ;;  %v1856_v46 = vld [vmem:[#allocation2 + $0xf8] sm:$0xf0] }
  0xfe   :  { %556 = vperm.xlu2 %2044, %v466_v57   ;;  %746 = vperm.xlu1 %2043, %v466_v57   ;;  %v1987_v57 = vld [vmem:[#allocation2 + $0xf4] sm:$0xf0] }
 0x103   :  { %v468_v2 = vpop.f32.mrf.mxu1 }
 0x104   :  { %v469_v7 = vadd.f32 %v468_v2, %v379_v58  ;;  %v2469_v58 = vor.u32 %v1987_v57, %v1854_v53  ;;  %v409_v57 = vpop.f32.mrf.mxu2 }
 0x106   :  { %507 = vmatmul.bf16.gmra.mxu1 %v2448_v1  ;;  %561 = vperm.xlu2 %2044, %v469_v7  }
 0x107   :  { %2047 = vset.pattern.permute.xlu1 %v2268_v6  ;;  %443 = vmatmul.bf16.gmra.mxu3 %v2469_v58 }
 0x10b   :  { %v470_v18 = vpop.f32.mrf.mxu1 }
 0x10c   :  { %v471_v19 = vadd.f32 %v470_v18, %v381_v13 }
 0x10e   :  { %2046 = vset.pattern.permute.xlu2 %v2267_v5  ;;  %566 = vperm.xlu1 %2047, %v471_v19  }
 0x10f   :  { %754 = vperm.xlu0 %2045, %v471_v19   ;;  %750 = vperm.xlu2 %2046, %v469_v7   ;;  %v1840_v7 = vld [vmem:[#allocation2 + $0xd8] sm:$0xf0]  ;;  %v2008_v19 = vld [vmem:[%s3023_s4 + $0x20] sm:$0xff] }
 0x113   :  { %v473_v29 = vpop.f32.mrf.mxu1 }
 0x114   :  { %v474_v31 = vadd.f32 %v473_v29, %v384_v25  ;;  %v1984_v25 = vld [vmem:[#allocation2 + $0xe4] sm:$0xf]  ;;  %v1848_v29 = vld [vmem:[#allocation2 + $0xe8] sm:$0xf0] }
 0x115   :  { %v2501_v32 = vor.u32 %v1984_v25, %v1848_v29 }
 0x116   :  { %512 = vmatmul.bf16.gmra.mxu1 %v2456_v28  ;;  %571 = vperm.xlu1 %2047, %v474_v31  }
 0x117   :  { %758 = vperm.xlu0 %2045, %v474_v31   ;;  %2048 = vset.pattern.permute.xlu2 %v2268_v6  ;;  %v2006_v31 = vld [vmem:[%s3023_s4 + $0x10] sm:$0xff] }
 0x11b   :  { %v475_v40 = vpop.f32.mrf.mxu1 }
 0x11c   :  { %v476_v41 = vadd.f32 %v475_v40, %v386_v38  ;;  %v2005_v38 = vld [vmem:[%s3023_s4 + $0x8] sm:$0xff]  ;;  %v2004_v40 = vld [vmem:[%s3023_s4] sm:$0xff] }
 0x11e   :  { %576 = vperm.xlu2 %2048, %v476_v41   ;;  %2049 = vset.pattern.permute.xlu1 %v2267_v5 }
 0x11f   :  { %762 = vperm.xlu1 %2049, %v476_v41   ;;  %2050 = vset.pattern.permute.xlu0 %v2268_v6 }
 0x123   :  { %v478_v49 = vpop.f32.mrf.mxu1 }
 0x124   :  { %v479_v50 = vadd.f32 %v478_v49, %v2397_v55  ;;  %v1982_v55 = vld [vmem:[#allocation2 + $0xd4] sm:$0xf] }
 0x125   :  { %v2481_v12 = vor.u32 %v1982_v55, %v1840_v7 }
 0x126   :  { %517 = vmatmul.bf16.gmra.mxu1 %v2465_v47  ;;  %581 = vperm.xlu2 %2048, %v479_v50  }
 0x127   :  { %766 = vperm.xlu1 %2049, %v479_v50  }
 0x12b   :  { %v480_v61 = vpop.f32.mrf.mxu1 }
 0x12c   :  { %v481_v2 = vadd.f32 %v480_v61, %v2400_v56  ;;  %v2009_v56 = vld [vmem:[%s3023_s4 + $0x28] sm:$0xff] }
 0x12d   :  { %1076 = vmatpush.bf16.msrb.mxu2 %v2009_v56  ;;  %v411_v56 = vpop.f32.mrf.mxu2 }
 0x12e   :  { %2051 = vset.pattern.permute.xlu2 %v2267_v5  ;;  %586 = vperm.xlu0 %2050, %v481_v2  }
 0x12f   :  { %770 = vperm.xlu2 %2051, %v481_v2   ;;  %2052 = vset.pattern.permute.xlu1 %v2268_v6  ;;  %v2527_v2 = vld [vmem:[%s3021_s2] ss:$0 sm:$0xff] }
 0x131   :  { %1077 = vmatpush.bf16.msrb.mxu2 %v2008_v19 }
 0x133   :  { %v483_v13 = vpop.f32.mrf.mxu1 }
 0x134   :  { %v484_v18 = vadd.f32 %v483_v13, %v2404_v60 }
 0x135   :  { %1078 = vmatpush.bf16.msrb.mxu2 %v2007_v24 }
 0x136   :  { %522 = vmatmul.bf16.gmra.mxu1 %v2481_v12  ;;  %591 = vperm.xlu1 %2052, %v484_v18  }
 0x137   :  { %2053 = vset.pattern.permute.xlu0 %v2267_v5  ;;  %2054 = vset.pattern.permute.xlu2 %v2268_v6 }
 0x138   :  { %774 = vperm.xlu0 %2053, %v484_v18   ;;  %v2537_v18 = vld [vmem:[%s3022_s3] ss:$0 sm:$0xff] }
 0x139   :  { %1079 = vmatpush.bf16.msrb.mxu2 %v2006_v31 }
 0x13b   :  { %v485_v23 = vpop.f32.mrf.mxu1 }
 0x13c   :  { %v486_v60 = vadd.f32 %v485_v23, %v2410_v0 }
 0x13d   :  { %1080 = vmatpush.bf16.msrb.mxu2 %v2005_v38 }
 0x13e   :  { %596 = vperm.xlu2 %2054, %v486_v60   ;;  %2055 = vset.pattern.permute.xlu1 %v2267_v5 }
 0x13f   :  { %778 = vperm.xlu1 %2055, %v486_v60  }
 0x141   :  { %1081 = vmatpush.bf16.msrb.mxu2 %v2004_v40 }
 0x143   :  { %v488_v35 = vpop.f32.mrf.mxu1 }
 0x144   :  { %v489_v0 = vadd.f32 %v488_v35, %v2414_v4  ;;  %v1986_v4 = vld [vmem:[#allocation2 + $0xf4] sm:$0xf] }
 0x145   :  { %v2514_v49 = vor.u32 %v1986_v4, %v1856_v46 }
 0x146   :  { %527 = vmatmul.bf16.gmra.mxu1 %v2501_v32  ;;  %601 = vperm.xlu2 %2054, %v489_v0  }
 0x147   :  { %2057 = vset.pattern.permute.xlu1 %v2268_v6  ;;  %3027 = vst [vmem:[#allocation8_spill] sm:$0xff] %v2514_v49 }
 0x14b   :  { %v490_v41 = vpop.f32.mrf.mxu1 }
 0x14c   :  { %v491_v44 = vadd.f32 %v490_v41, %v2423_v11  ;;  %v2522_v11 = vld [vmem:[%s3021_s2 + $0x1] ss:$0 sm:$0xff] }
 0x14e   :  { %2056 = vset.pattern.permute.xlu2 %v2267_v5  ;;  %606 = vperm.xlu1 %2057, %v491_v44  }
 0x14f   :  { %786 = vperm.xlu0 %2053, %v491_v44   ;;  %782 = vperm.xlu2 %2056, %v489_v0   ;;  %v414_v44 = vpop.f32.mrf.mxu2 }
 0x153   :  { %v493_v50 = vpop.f32.mrf.mxu1 }
 0x154   :  { %v494_v53 = vadd.f32 %v493_v50, %v2427_v15  ;;  %v552_v15 = vpop.permute.xlu2 %551 }
 0x156   :  { %532 = vmatmul.bf16.gmra.mxu1 %v2514_v49  ;;  %611 = vperm.xlu1 %2057, %v494_v53  }
 0x157   :  { %790 = vperm.xlu0 %2053, %v494_v53   ;;  %2058 = vset.pattern.permute.xlu2 %v2268_v6 }
 0x158   :  { %v735_v61 = vpop.permute.xlu1 %734 }
 0x159   :  { %v542_v62 = vpop.permute.xlu0 %541  ;;  %v862_v7 = vmul.f32 %v2522_v11, %v735_v61 }
 0x15a   :  { %v700_v8 = vmul.f32 %v2527_v2, %v542_v62  ;;  %v702_v62 = vmul.f32 %v2527_v2, %v552_v15 }
 0x15b   :  { %v495_v55 = vpop.f32.mrf.mxu1 }
 0x15c   :  { %v496_v13 = vadd.f32 %v495_v55, %v2433_v21  ;;  %v894_v19 = vadd.f32 %v862_v7, %v700_v8  ;;  %v557_v38 = vpop.permute.xlu2 %556 }
 0x15d   :  { %v703_v8 = vmul.f32 %v2527_v2, %v557_v38 }
 0x15e   :  { %616 = vperm.xlu2 %2058, %v496_v13   ;;  %2059 = vset.pattern.permute.xlu1 %v2267_v5  ;;  %v930_v29 = vadd.f32 %v2537_v18, %v894_v19 }
 0x15f   :  { %794 = vperm.xlu1 %2059, %v496_v13   ;;  %2060 = vset.pattern.permute.xlu0 %v2268_v6 }
 0x160   :  { %v739_v23 = vpop.permute.xlu1 %738  ;;  %v962_v40 = vmax.f32 %v930_v29, 0.0 }
 0x161   :  { %v863_v24 = vmul.f32 %v2522_v11, %v739_v23  ;;  %v547_v60 = vpop.permute.xlu0 %546  ;;  %v416_v23 = vpop.f32.mrf.mxu2 }
 0x162   :  { %v701_v25 = vmul.f32 %v2527_v2, %v547_v60 }
 0x163   :  { %v498_v21 = vpop.f32.mrf.mxu1 }
 0x164   :  { %v895_v31 = vadd.f32 %v863_v24, %v701_v25  ;;  %v499_v35 = vadd.f32 %v498_v21, %v409_v57  ;;  %v562_v57 = vpop.permute.xlu2 %561 }
 0x166   :  { %v931_v0 = vadd.f32 %v2537_v18, %v895_v31  ;;  %621 = vperm.xlu2 %2058, %v499_v35  }
 0x167   :  { %798 = vperm.xlu1 %2059, %v499_v35  }
 0x168   :  { %v963_v41 = vmax.f32 %v931_v0, 0.0 }
 0x16a   :  { %v743_v4 = vpop.permute.xlu0 %742  ;;  %v994_v46 = vpack.c.bf16 %v963_v41, %v962_v40  ;;  %v419_v40 = vpop.f32.mrf.mxu2  ;;  %v704_v41 = vmul.f32 %v2527_v2, %v562_v57 }
 0x16b   :  { %v864_v50 = vmul.f32 %v2522_v11, %v743_v4  ;;  %v500_v53 = vpop.f32.mrf.mxu1 }
 0x16c   :  { %v501_v61 = vadd.f32 %v500_v53, %v411_v56  ;;  %1082 = vmatmul.bf16.vlgmr.msrb.gmra.mxu2 %v994_v46  ;;  %v751_v29 = vpop.permute.xlu2 %750 }
 0x16d   :  { %v896_v55 = vadd.f32 %v864_v50, %v702_v62  ;;  %v866_v38 = vmul.f32 %v2522_v11, %v751_v29 }
 0x16e   :  { %2061 = vset.pattern.permute.xlu2 %v2267_v5  ;;  %626 = vperm.xlu0 %2060, %v501_v61  }
 0x16f   :  { %802 = vperm.xlu2 %2061, %v501_v61   ;;  %2062 = vset.pattern.permute.xlu1 %v2268_v6  ;;  %v932_v56 = vadd.f32 %v2537_v18, %v896_v55 }
 0x170   :  { %v747_v7 = vpop.permute.xlu1 %746 }
 0x171   :  { %v865_v13 = vmul.f32 %v2522_v11, %v747_v7  ;;  %v964_v25 = vmax.f32 %v932_v56, 0.0 }
 0x172   :  { %v421_v57 = vpop.f32.mrf.mxu2 }
 0x173   :  { %v897_v19 = vadd.f32 %v865_v13, %v703_v8  ;;  %v503_v24 = vpop.f32.mrf.mxu1 }
 0x174   :  { %v504_v60 = vadd.f32 %v503_v24, %v414_v44  ;;  %v898_v44 = vadd.f32 %v866_v38, %v704_v41 }
 0x175   :  { %v933_v15 = vadd.f32 %v2537_v18, %v897_v19 }
 0x176   :  { %631 = vperm.xlu1 %2062, %v504_v60   ;;  %2063 = vset.pattern.permute.xlu0 %v2267_v5  ;;  %v934_v7 = vadd.f32 %v2537_v18, %v898_v44 }
 0x177   :  { %806 = vperm.xlu0 %2063, %v504_v60   ;;  %v965_v21 = vmax.f32 %v933_v15, 0.0  ;;  %2064 = vset.pattern.permute.xlu2 %v2268_v6 }
 0x178   :  { %v966_v19 = vmax.f32 %v934_v7, 0.0  ;;  %v577_v24 = vpop.permute.xlu2 %576 }
 0x179   :  { %v995_v31 = vpack.c.bf16 %v965_v21, %v964_v25 }
 0x17b   :  { %v505_v35 = vpop.f32.mrf.mxu1 }
 0x17c   :  { %v506_v0 = vadd.f32 %v505_v35, %v416_v23  ;;  %1087 = vmatmul.bf16.gmra.mxu2 %v995_v31  ;;  %v424_v35 = vpop.f32.mrf.mxu2 }
 0x17e   :  { %636 = vperm.xlu2 %2064, %v506_v0   ;;  %2065 = vset.pattern.permute.xlu1 %v2267_v5 }
 0x17f   :  { %810 = vperm.xlu1 %2065, %v506_v0   ;;  %v707_v0 = vmul.f32 %v2527_v2, %v577_v24 }
 0x180   :  { %v567_v4 = vpop.permute.xlu1 %566  ;;  %v582_v41 = vpop.permute.xlu2 %581 }
 0x181   :  { %v705_v46 = vmul.f32 %v2527_v2, %v567_v4  ;;  %v755_v50 = vpop.permute.xlu0 %754  ;;  %v708_v24 = vmul.f32 %v2527_v2, %v582_v41 }
 0x182   :  { %v867_v53 = vmul.f32 %v2522_v11, %v755_v50 }
 0x183   :  { %v508_v61 = vpop.f32.mrf.mxu1 }
 0x184   :  { %v899_v62 = vadd.f32 %v867_v53, %v705_v46  ;;  %v509_v55 = vadd.f32 %v508_v61, %v419_v40  ;;  %v429_v53 = vpop.f32.mrf.mxu3 }
 0x186   :  { %641 = vperm.xlu2 %2064, %v509_v55   ;;  %v935_v8 = vadd.f32 %v2537_v18, %v899_v62 }
 0x187   :  { %2067 = vset.pattern.permute.xlu1 %v2268_v6 }
 0x188   :  { %v572_v13 = vpop.permute.xlu1 %571  ;;  %v967_v23 = vmax.f32 %v935_v8, 0.0 }
 0x189   :  { %v759_v56 = vpop.permute.xlu0 %758  ;;  %v706_v25 = vmul.f32 %v2527_v2, %v572_v13 }
 0x18a   :  { %v996_v60 = vpack.c.bf16 %v967_v23, %v966_v19  ;;  %v868_v21 = vmul.f32 %v2522_v11, %v759_v56  ;;  %v771_v56 = vpop.permute.xlu2 %770 }
 0x18b   :  { %v510_v15 = vpop.f32.mrf.mxu1 }
 0x18c   :  { %v511_v29 = vadd.f32 %v510_v15, %v421_v57  ;;  %1092 = vmatmul.bf16.gmra.mxu2 %v996_v60  ;;  %v900_v31 = vadd.f32 %v868_v21, %v706_v25  ;;  %v426_v57 = vpop.f32.mrf.mxu2  ;;  %v431_v15 = vpop.f32.mrf.mxu3  ;;  %v871_v21 = vmul.f32 %v2522_v11, %v771_v56 }
 0x18e   :  { %2066 = vset.pattern.permute.xlu2 %v2267_v5  ;;  %646 = vperm.xlu1 %2067, %v511_v29   ;;  %v936_v50 = vadd.f32 %v2537_v18, %v900_v31 }
 0x18f   :  { %818 = vperm.xlu0 %2063, %v511_v29   ;;  %814 = vperm.xlu2 %2066, %v509_v55  }
 0x190   :  { %v968_v62 = vmax.f32 %v936_v50, 0.0 }
 0x191   :  { %v763_v38 = vpop.permute.xlu1 %762 }
 0x192   :  { %v869_v40 = vmul.f32 %v2522_v11, %v763_v38 }
 0x193   :  { %v513_v44 = vpop.f32.mrf.mxu1 }
 0x194   :  { %v901_v4 = vadd.f32 %v869_v40, %v707_v0  ;;  %v514_v46 = vadd.f32 %v513_v44, %v424_v35  ;;  %v434_v50 = vpop.f32.mrf.mxu3 }
 0x196   :  { %651 = vperm.xlu1 %2067, %v514_v46   ;;  %v937_v61 = vadd.f32 %v2537_v18, %v901_v4 }
 0x197   :  { %822 = vperm.xlu0 %2063, %v514_v46   ;;  %2068 = vset.pattern.permute.xlu2 %v2268_v6 }
 0x198   :  { %v969_v55 = vmax.f32 %v937_v61, 0.0  ;;  %v597_v40 = vpop.permute.xlu2 %596 }
 0x199   :  { %v767_v7 = vpop.permute.xlu1 %766 }
 0x19a   :  { %v997_v8 = vpack.c.bf16 %v969_v55, %v968_v62  ;;  %v870_v13 = vmul.f32 %v2522_v11, %v767_v7 }
 0x19b   :  { %v515_v19 = vpop.f32.mrf.mxu1 }
 0x19c   :  { %v516_v23 = vadd.f32 %v515_v19, %v426_v57  ;;  %1097 = vmatmul.bf16.gmra.mxu2 %v997_v8  ;;  %v902_v60 = vadd.f32 %v870_v13, %v708_v24  ;;  %v436_v56 = vpop.f32.mrf.mxu3 }
 0x19e   :  { %656 = vperm.xlu2 %2068, %v516_v23   ;;  %2069 = vset.pattern.permute.xlu1 %v2267_v5  ;;  %v938_v38 = vadd.f32 %v2537_v18, %v902_v60 }
 0x19f   :  { %826 = vperm.xlu1 %2069, %v516_v23   ;;  %2070 = vset.pattern.permute.xlu0 %v2268_v6  ;;  %v711_v23 = vmul.f32 %v2527_v2, %v597_v40 }
 0x1a0   :  { %v587_v25 = vpop.permute.xlu0 %586  ;;  %v970_v44 = vmax.f32 %v938_v38, 0.0 }
 0x1a1   :  { %v709_v29 = vmul.f32 %v2527_v2, %v587_v25 }
 0x1a3   :  { %v903_v31 = vadd.f32 %v871_v21, %v709_v29  ;;  %v518_v35 = vpop.f32.mrf.mxu1 }
 0x1a4   :  { %v519_v0 = vadd.f32 %v518_v35, %v429_v53  ;;  %v602_v53 = vpop.permute.xlu2 %601 }
 0x1a5   :  { %v939_v41 = vadd.f32 %v2537_v18, %v903_v31 }
 0x1a6   :  { %661 = vperm.xlu2 %2068, %v519_v0  }
 0x1a7   :  { %830 = vperm.xlu1 %2069, %v519_v0   ;;  %v971_v4 = vmax.f32 %v939_v41, 0.0 }
 0x1a8   :  { %v592_v46 = vpop.permute.xlu1 %591 }
 0x1a9   :  { %v998_v61 = vpack.c.bf16 %v971_v4, %v970_v44  ;;  %v710_v7 = vmul.f32 %v2527_v2, %v592_v46  ;;  %v439_v4 = vpop.f32.mrf.mxu3  ;;  %v712_v46 = vmul.f32 %v2527_v2, %v602_v53 }
 0x1aa   :  { %v775_v62 = vpop.permute.xlu0 %774 }
 0x1ab   :  { %v520_v55 = vpop.f32.mrf.mxu1  ;;  %v872_v8 = vmul.f32 %v2522_v11, %v775_v62 }
 0x1ac   :  { %v521_v57 = vadd.f32 %v520_v55, %v431_v15  ;;  %1102 = vmatmul.bf16.gmra.mxu2 %v998_v61  ;;  %v783_v38 = vpop.permute.xlu2 %782 }
 0x1ad   :  { %v904_v13 = vadd.f32 %v872_v8, %v710_v7  ;;  %v874_v41 = vmul.f32 %v2522_v11, %v783_v38 }
 0x1ae   :  { %2071 = vset.pattern.permute.xlu2 %v2267_v5  ;;  %666 = vperm.xlu0 %2070, %v521_v57  }
 0x1af   :  { %834 = vperm.xlu2 %2071, %v521_v57   ;;  %2072 = vset.pattern.permute.xlu1 %v2268_v6  ;;  %v940_v15 = vadd.f32 %v2537_v18, %v904_v13 }
 0x1b1   :  { %v779_v19 = vpop.permute.xlu1 %778  ;;  %v972_v31 = vmax.f32 %v940_v15, 0.0  ;;  %v441_v53 = vpop.f32.mrf.mxu3 }
 0x1b2   :  { %v873_v24 = vmul.f32 %v2522_v11, %v779_v19 }
 0x1b3   :  { %v523_v60 = vpop.f32.mrf.mxu1 }
 0x1b4   :  { %v905_v25 = vadd.f32 %v873_v24, %v711_v23  ;;  %v524_v21 = vadd.f32 %v523_v60, %v434_v50  ;;  %v906_v50 = vadd.f32 %v874_v41, %v712_v46 }
 0x1b6   :  { %671 = vperm.xlu1 %2072, %v524_v21   ;;  %2073 = vset.pattern.permute.xlu0 %v2267_v5  ;;  %v941_v29 = vadd.f32 %v2537_v18, %v905_v25  ;;  %v942_v19 = vadd.f32 %v2537_v18, %v906_v50 }
 0x1b7   :  { %838 = vperm.xlu0 %2073, %v524_v21   ;;  %2074 = vset.pattern.permute.xlu2 %v2268_v6 }
 0x1b8   :  { %v973_v35 = vmax.f32 %v941_v29, 0.0  ;;  %v617_v25 = vpop.permute.xlu2 %616 }
 0x1ba   :  { %v999_v0 = vpack.c.bf16 %v973_v35, %v972_v31 }
 0x1bb   :  { %v525_v40 = vpop.f32.mrf.mxu1 }
 0x1bc   :  { %v526_v44 = vadd.f32 %v525_v40, %v436_v56  ;;  %1107 = vmatmul.bf16.gmra.mxu2 %v999_v0  ;;  %v974_v56 = vmax.f32 %v942_v19, 0.0  ;;  %v444_v40 = vpop.f32.mrf.mxu3 }
 0x1be   :  { %676 = vperm.xlu2 %2074, %v526_v44   ;;  %2075 = vset.pattern.permute.xlu1 %v2267_v5 }
 0x1bf   :  { %842 = vperm.xlu1 %2075, %v526_v44   ;;  %v715_v44 = vmul.f32 %v2527_v2, %v617_v25 }
 0x1c0   :  { %v607_v61 = vpop.permute.xlu1 %606  ;;  %v622_v46 = vpop.permute.xlu2 %621 }
 0x1c1   :  { %v713_v62 = vmul.f32 %v2527_v2, %v607_v61  ;;  %v787_v55 = vpop.permute.xlu0 %786 }
 0x1c2   :  { %v875_v7 = vmul.f32 %v2522_v11, %v787_v55 }
 0x1c3   :  { %v528_v8 = vpop.f32.mrf.mxu1 }
 0x1c4   :  { %v907_v57 = vadd.f32 %v875_v7, %v713_v62  ;;  %v529_v13 = vadd.f32 %v528_v8, %v439_v4 }
 0x1c6   :  { %681 = vperm.xlu2 %2074, %v529_v13   ;;  %v943_v23 = vadd.f32 %v2537_v18, %v907_v57 }
 0x1c7   :  { %2077 = vset.pattern.permute.xlu1 %v2268_v6 }
 0x1c8   :  { %v612_v24 = vpop.permute.xlu1 %611  ;;  %v975_v60 = vmax.f32 %v943_v23, 0.0  ;;  %v446_v23 = vpop.f32.mrf.mxu3 }
 0x1c9   :  { %v791_v21 = vpop.permute.xlu0 %790  ;;  %v714_v31 = vmul.f32 %v2527_v2, %v612_v24  ;;  %v803_v25 = vpop.permute.xlu2 %802 }
 0x1ca   :  { %v1000_v15 = vpack.c.bf16 %v975_v60, %v974_v56  ;;  %v876_v35 = vmul.f32 %v2522_v11, %v791_v21  ;;  %v716_v60 = vmul.f32 %v2527_v2, %v622_v46 }
 0x1cb   :  { %v530_v29 = vpop.f32.mrf.mxu1 }
 0x1cc   :  { %v531_v38 = vadd.f32 %v530_v29, %v441_v53  ;;  %1112 = vmatmul.bf16.gmra.mxu2 %v1000_v15  ;;  %v908_v0 = vadd.f32 %v876_v35, %v714_v31 }
 0x1ce   :  { %2076 = vset.pattern.permute.xlu2 %v2267_v5  ;;  %686 = vperm.xlu1 %2077, %v531_v38   ;;  %v944_v55 = vadd.f32 %v2537_v18, %v908_v0 }
 0x1cf   :  { %850 = vperm.xlu0 %2073, %v531_v38   ;;  %846 = vperm.xlu2 %2076, %v529_v13  }
 0x1d0   :  { %v976_v8 = vmax.f32 %v944_v55, 0.0 }
 0x1d1   :  { %v795_v41 = vpop.permute.xlu1 %794 }
 0x1d2   :  { %v877_v4 = vmul.f32 %v2522_v11, %v795_v41 }
 0x1d3   :  { %v533_v50 = vpop.f32.mrf.mxu1 }
 0x1d4   :  { %v909_v61 = vadd.f32 %v877_v4, %v715_v44  ;;  %v534_v62 = vadd.f32 %v533_v50, %v444_v40 }
 0x1d6   :  { %691 = vperm.xlu1 %2077, %v534_v62   ;;  %v945_v7 = vadd.f32 %v2537_v18, %v909_v61 }
 0x1d7   :  { %854 = vperm.xlu0 %2073, %v534_v62   ;;  %2078 = vset.pattern.permute.xlu2 %v2268_v6  ;;  %v879_v6 = vmul.f32 %v2522_v11, %v803_v25 }
 0x1d8   :  { %v977_v57 = vmax.f32 %v945_v7, 0.0  ;;  %v637_v38 = vpop.permute.xlu2 %636 }
 0x1d9   :  { %v799_v13 = vpop.permute.xlu1 %798 }
 0x1da   :  { %v1001_v19 = vpack.c.bf16 %v977_v57, %v976_v8  ;;  %v878_v53 = vmul.f32 %v2522_v11, %v799_v13  ;;  %v719_v8 = vmul.f32 %v2527_v2, %v637_v38 }
 0x1db   :  { %v535_v24 = vpop.f32.mrf.mxu1 }
 0x1dc   :  { %v536_v56 = vadd.f32 %v535_v24, %v446_v23  ;;  %1117 = vmatmul.bf16.gmra.mxu2 %v1001_v19  ;;  %v910_v21 = vadd.f32 %v878_v53, %v716_v60 }
 0x1de   :  { %696 = vperm.xlu2 %2078, %v536_v56   ;;  %2079 = vset.pattern.permute.xlu1 %v2267_v5  ;;  %v946_v31 = vadd.f32 %v2537_v18, %v910_v21 }
 0x1df   :  { %858 = vperm.xlu1 %2079, %v536_v56  }
 0x1e0   :  { %v627_v15 = vpop.permute.xlu0 %626  ;;  %v978_v40 = vmax.f32 %v946_v31, 0.0  ;;  %v642_v61 = vpop.permute.xlu2 %641 }
 0x1e1   :  { %v717_v29 = vmul.f32 %v2527_v2, %v627_v15 }
 0x1e3   :  { %v911_v35 = vadd.f32 %v879_v6, %v717_v29  ;;  %v720_v6 = vmul.f32 %v2527_v2, %v642_v61 }
 0x1e5   :  { %v947_v0 = vadd.f32 %v2537_v18, %v911_v35 }
 0x1e7   :  { %v979_v41 = vmax.f32 %v947_v0, 0.0 }
 0x1e8   :  { %v632_v44 = vpop.permute.xlu1 %631 }
 0x1e9   :  { %v807_v4 = vpop.permute.xlu0 %806  ;;  %v1002_v46 = vpack.c.bf16 %v979_v41, %v978_v40  ;;  %v718_v5 = vmul.f32 %v2527_v2, %v632_v44  ;;  %v815_v25 = vpop.permute.xlu2 %814 }
 0x1ea   :  { %v880_v50 = vmul.f32 %v2522_v11, %v807_v4  ;;  %v882_v15 = vmul.f32 %v2522_v11, %v815_v25 }
 0x1ec   :  { %1122 = vmatmul.bf16.gmra.mxu2 %v1002_v46  ;;  %v912_v55 = vadd.f32 %v880_v50, %v718_v5  ;;  %v914_v31 = vadd.f32 %v882_v15, %v720_v6 }
 0x1ee   :  { %v948_v13 = vadd.f32 %v2537_v18, %v912_v55  ;;  %v950_v41 = vadd.f32 %v2537_v18, %v914_v31 }
 0x1ef   :  { %v2612_v62 = vpop.f32.mrf.mxu2 }
 0x1f0   :  { %v980_v24 = vmax.f32 %v948_v13, 0.0  ;;  %v982_v5 = vmax.f32 %v950_v41, 0.0 }
 0x1f1   :  { %v811_v7 = vpop.permute.xlu1 %810 }
 0x1f2   :  { %v881_v57 = vmul.f32 %v2522_v11, %v811_v7 }
 0x1f4   :  { %v913_v19 = vadd.f32 %v881_v57, %v719_v8 }
 0x1f6   :  { %v949_v23 = vadd.f32 %v2537_v18, %v913_v19 }
 0x1f7   :  { %v2618_v53 = vpop.f32.mrf.mxu2 }
 0x1f8   :  { %v981_v56 = vmax.f32 %v949_v23, 0.0  ;;  %v657_v7 = vpop.permute.xlu2 %656 }
 0x1f9   :  { %v723_v25 = vmul.f32 %v2527_v2, %v657_v7 }
 0x1fa   :  { %v1003_v21 = vpack.c.bf16 %v981_v56, %v980_v24 }
 0x1fc   :  { %1127 = vmatmul.bf16.gmra.mxu2 %v1003_v21 }
 0x1ff   :  { %v2624_v29 = vpop.f32.mrf.mxu2 }
 0x200   :  { %v647_v35 = vpop.permute.xlu1 %646  ;;  %v662_v15 = vpop.permute.xlu2 %661 }
 0x201   :  { %v721_v38 = vmul.f32 %v2527_v2, %v647_v35  ;;  %v819_v0 = vpop.permute.xlu0 %818 }
 0x202   :  { %v883_v40 = vmul.f32 %v2522_v11, %v819_v0 }
 0x204   :  { %v915_v44 = vadd.f32 %v883_v40, %v721_v38 }
 0x206   :  { %v951_v4 = vadd.f32 %v2537_v18, %v915_v44 }
 0x207   :  { %v2630_v46 = vpop.f32.mrf.mxu2 }
 0x208   :  { %v983_v50 = vmax.f32 %v951_v4, 0.0  ;;  %v652_v55 = vpop.permute.xlu1 %651 }
 0x209   :  { %v823_v8 = vpop.permute.xlu0 %822  ;;  %v722_v13 = vmul.f32 %v2527_v2, %v652_v55  ;;  %v835_v55 = vpop.permute.xlu2 %834 }
 0x20a   :  { %v1004_v57 = vpack.c.bf16 %v983_v50, %v982_v5  ;;  %v884_v19 = vmul.f32 %v2522_v11, %v823_v8  ;;  %v724_v50 = vmul.f32 %v2527_v2, %v662_v15 }
 0x20c   :  { %1132 = vmatmul.bf16.gmra.mxu2 %v1004_v57  ;;  %v916_v24 = vadd.f32 %v884_v19, %v722_v13  ;;  %v887_v13 = vmul.f32 %v2522_v11, %v835_v55 }
 0x20e   :  { %v952_v6 = vadd.f32 %v2537_v18, %v916_v24 }
 0x20f   :  { %v2636_v23 = vpop.f32.mrf.mxu2 }
 0x210   :  { %v984_v0 = vmax.f32 %v952_v6, 0.0 }
 0x211   :  { %v827_v56 = vpop.permute.xlu1 %826 }
 0x212   :  { %v885_v21 = vmul.f32 %v2522_v11, %v827_v56 }
 0x214   :  { %v917_v31 = vadd.f32 %v885_v21, %v723_v25 }
 0x216   :  { %v953_v35 = vadd.f32 %v2537_v18, %v917_v31 }
 0x217   :  { %v2642_v38 = vpop.f32.mrf.mxu2 }
 0x218   :  { %v985_v40 = vmax.f32 %v953_v35, 0.0  ;;  %v677_v25 = vpop.permute.xlu2 %676 }
 0x219   :  { %v831_v44 = vpop.permute.xlu1 %830 }
 0x21a   :  { %v1005_v4 = vpack.c.bf16 %v985_v40, %v984_v0  ;;  %v886_v5 = vmul.f32 %v2522_v11, %v831_v44 }
 0x21c   :  { %1137 = vmatmul.bf16.gmra.mxu2 %v1005_v4  ;;  %v918_v7 = vadd.f32 %v886_v5, %v724_v50 }
 0x21e   :  { %v954_v24 = vadd.f32 %v2537_v18, %v918_v7 }
 0x21f   :  { %v2648_v8 = vpop.f32.mrf.mxu2 }
 0x220   :  { %v667_v57 = vpop.permute.xlu0 %666  ;;  %v986_v6 = vmax.f32 %v954_v24, 0.0  ;;  %v682_v50 = vpop.permute.xlu2 %681 }
 0x221   :  { %v725_v19 = vmul.f32 %v2527_v2, %v667_v57 }
 0x223   :  { %v919_v56 = vadd.f32 %v887_v13, %v725_v19  ;;  %v727_v13 = vmul.f32 %v2527_v2, %v677_v25 }
 0x225   :  { %v955_v21 = vadd.f32 %v2537_v18, %v919_v56 }
 0x227   :  { %v987_v31 = vmax.f32 %v955_v21, 0.0  ;;  %v2654_v35 = vpop.f32.mrf.mxu2 }
 0x228   :  { %v672_v15 = vpop.permute.xlu1 %671 }
 0x229   :  { %v839_v40 = vpop.permute.xlu0 %838  ;;  %v1006_v44 = vpack.c.bf16 %v987_v31, %v986_v6  ;;  %v726_v4 = vmul.f32 %v2527_v2, %v672_v15  ;;  %v847_v15 = vpop.permute.xlu2 %846 }
 0x22a   :  { %v888_v5 = vmul.f32 %v2522_v11, %v839_v40  ;;  %v890_v40 = vmul.f32 %v2522_v11, %v847_v15 }
 0x22c   :  { %1142 = vmatmul.bf16.gmra.mxu2 %v1006_v44  ;;  %v920_v7 = vadd.f32 %v888_v5, %v726_v4  ;;  %v728_v44 = vmul.f32 %v2527_v2, %v682_v50 }
 0x22e   :  { %v956_v24 = vadd.f32 %v2537_v18, %v920_v7  ;;  %v922_v5 = vadd.f32 %v890_v40, %v728_v44 }
 0x22f   :  { %v1103_v55 = vpop.f32.mrf.mxu2 }
 0x230   :  { %v988_v6 = vmax.f32 %v956_v24, 0.0 }
 0x231   :  { %v843_v57 = vpop.permute.xlu1 %842 }
 0x232   :  { %v889_v19 = vmul.f32 %v2522_v11, %v843_v57 }
 0x234   :  { %v921_v56 = vadd.f32 %v889_v19, %v727_v13  ;;  %v958_v13 = vadd.f32 %v2537_v18, %v922_v5 }
 0x236   :  { %v957_v21 = vadd.f32 %v2537_v18, %v921_v56 }
 0x237   :  { %v1105_v60 = vpop.f32.mrf.mxu2 }
 0x238   :  { %v989_v31 = vmax.f32 %v957_v21, 0.0  ;;  %v990_v21 = vmax.f32 %v958_v13, 0.0  ;;  %v697_v44 = vpop.permute.xlu2 %696 }
 0x239   :  { %v731_v5 = vmul.f32 %v2527_v2, %v697_v44 }
 0x23a   :  { %v1007_v61 = vpack.c.bf16 %v989_v31, %v988_v6 }
 0x23c   :  { %1147 = vmatmul.bf16.gmra.mxu2 %v1007_v61 }
 0x23f   :  { %v1108_v4 = vpop.f32.mrf.mxu2 }
 0x240   :  { %v687_v25 = vpop.permute.xlu1 %686 }
 0x241   :  { %v729_v57 = vmul.f32 %v2527_v2, %v687_v25  ;;  %v851_v41 = vpop.permute.xlu0 %850 }
 0x242   :  { %v891_v7 = vmul.f32 %v2522_v11, %v851_v41 }
 0x244   :  { %v923_v19 = vadd.f32 %v891_v7, %v729_v57 }
 0x246   :  { %v959_v24 = vadd.f32 %v2537_v18, %v923_v19 }
 0x247   :  { %v1110_v56 = vpop.f32.mrf.mxu2 }
 0x248   :  { %v991_v6 = vmax.f32 %v959_v24, 0.0  ;;  %v692_v31 = vpop.permute.xlu1 %691 }
 0x249   :  { %v855_v61 = vpop.permute.xlu0 %854  ;;  %v730_v50 = vmul.f32 %v2527_v2, %v692_v31  ;;  %v1168_v2 = vpack.c.bf16 %v1110_v56, %v1108_v4  ;;  %v3031_v4 = vpack.c.bf16 %v2618_v53, %v2612_v62 }
 0x24a   :  { %v1008_v15 = vpack.c.bf16 %v991_v6, %v990_v21  ;;  %v892_v40 = vmul.f32 %v2522_v11, %v855_v61 }
 0x24c   :  { %1152 = vmatmul.bf16.gmra.mxu2 %v1008_v15  ;;  %v924_v0 = vadd.f32 %v892_v40, %v730_v50 }
 0x24e   :  { %v960_v7 = vadd.f32 %v2537_v18, %v924_v0 }
 0x24f   :  { %v1113_v25 = vpop.f32.mrf.mxu2 }
 0x250   :  { %v992_v21 = vmax.f32 %v960_v7, 0.0 }
 0x251   :  { %v859_v41 = vpop.permute.xlu1 %858 }
 0x252   :  { %v893_v57 = vmul.f32 %v2522_v11, %v859_v41  ;;  %v1167_v11 = vpack.c.bf16 %v1105_v60, %v1103_v55  ;;  %v3029_v41 = vpack.c.bf16 %v2642_v38, %v2636_v23 }
 0x254   :  { %v925_v13 = vadd.f32 %v893_v57, %v731_v5 }
 0x256   :  { %v961_v19 = vadd.f32 %v2537_v18, %v925_v13  ;;  %v3028_v18 = vpack.c.bf16 %v2654_v35, %v2648_v8 }
 0x257   :  { %v1115_v24 = vpop.f32.mrf.mxu2 }
 0x258   :  { %v993_v6 = vmax.f32 %v961_v19, 0.0  ;;  %v1169_v50 = vpack.c.bf16 %v1115_v24, %v1113_v25 }
 0x25a   :  { %v1009_v31 = vpack.c.bf16 %v993_v6, %v992_v21 }
 0x25c   :  { %1157 = vmatmul.bf16.gmra.mxu2 %v1009_v31 }
 0x25f   :  { %v1118_v61 = vpop.f32.mrf.mxu2 }
 0x267   :  { %v1120_v15 = vpop.f32.mrf.mxu2 }
 0x268   :  { %v1170_v49 = vpack.c.bf16 %v1120_v15, %v1118_v61 }
 0x26a   :  { %1183 = vmatpush.bf16.msrb.mxu3 %v1170_v49  ;;  %v3030_v49 = vpack.c.bf16 %v2630_v46, %v2624_v29 }
 0x26e   :  { %1184 = vmatpush.bf16.msrb.mxu3 %v1169_v50 }
 0x26f   :  { %v1123_v40 = vpop.f32.mrf.mxu2 }
 0x272   :  { %1185 = vmatpush.bf16.msrb.mxu3 %v1168_v2 }
 0x276   :  { %1186 = vmatpush.bf16.msrb.mxu3 %v1167_v11 }
 0x277   :  { %v1125_v0 = vpop.f32.mrf.mxu2 }
 0x278   :  { %v1171_v44 = vpack.c.bf16 %v1125_v0, %v1123_v40 }
 0x27a   :  { %1187 = vmatpush.bf16.msrb.mxu3 %v3028_v18 }
 0x27e   :  { %1188 = vmatpush.bf16.msrb.mxu3 %v3029_v41 }
 0x27f   :  { %v1128_v5 = vpop.f32.mrf.mxu2 }
 0x282   :  { %1189 = vmatpush.bf16.msrb.mxu3 %v3030_v49 }
 0x286   :  { %1190 = vmatpush.bf16.msrb.mxu3 %v3031_v4 }
 0x287   :  { %v1130_v60 = vpop.f32.mrf.mxu2 }
 0x288   :  { %v1172_v55 = vpack.c.bf16 %v1130_v60, %v1128_v5 }
 0x289   :  { %1191 = vmatmul.bf16.vlgmr.msrb.gmra.mxu3 %v2359_v22 }
 0x28f   :  { %v1133_v56 = vpop.f32.mrf.mxu2 }
 0x297   :  { %v1135_v8 = vpop.f32.mrf.mxu2 }
 0x298   :  { %v1173_v35 = vpack.c.bf16 %v1135_v8, %v1133_v56 }
 0x299   :  { %1196 = vmatmul.bf16.gmra.mxu3 %v2371_v30 }
 0x29f   :  { %v1138_v23 = vpop.f32.mrf.mxu2 }
 0x2a7   :  { %v1140_v38 = vpop.f32.mrf.mxu2 }
 0x2a8   :  { %v1174_v25 = vpack.c.bf16 %v1140_v38, %v1138_v23 }
 0x2a9   :  { %1201 = vmatmul.bf16.gmra.mxu3 %v2377_v36 }
 0x2af   :  { %v1143_v29 = vpop.f32.mrf.mxu2 }
 0x2b7   :  { %v1145_v46 = vpop.f32.mrf.mxu2 }
 0x2b8   :  { %v1175_v24 = vpack.c.bf16 %v1145_v46, %v1143_v29 }
 0x2b9   :  { %1206 = vmatmul.bf16.gmra.mxu3 %v2383_v42  ;;  %v2713_v42 = vld [vmem:[%s3024_s5] ss:$0 sm:$0xff]  ;;  %s2269_s5 = smov [#allocation5]  }
 0x2ba   :  { %s1717_s9 = sshll.u32 %s2269_s5, 4  ;;  %s1718_s9 = int_to_ptr.vmem [resolvable:$true] %s1717_s9 }
 0x2bf   :  { %v1148_v62 = vpop.f32.mrf.mxu2 }
 0x2c7   :  { %v1150_v53 = vpop.f32.mrf.mxu2 }
 0x2c8   :  { %v1176_v36 = vpack.c.bf16 %v1150_v53, %v1148_v62 }
 0x2c9   :  { %1211 = vmatmul.bf16.gmra.mxu3 %v2335_v10 }
 0x2cf   :  { %v1153_v57 = vpop.f32.mrf.mxu2 }
 0x2d7   :  { %v1155_v22 = vpop.f32.mrf.mxu2 }
 0x2d8   :  { %v1177_v19 = vpack.c.bf16 %v1155_v22, %v1153_v57 }
 0x2d9   :  { %1216 = vmatmul.bf16.gmra.mxu3 %v2350_v17 }
 0x2df   :  { %v1158_v7 = vpop.f32.mrf.mxu2 }
 0x2e7   :  { %v1160_v13 = vpop.f32.mrf.mxu2 }
 0x2e8   :  { %v1178_v30 = vpack.c.bf16 %v1160_v13, %v1158_v7 }
 0x2e9   :  { %1221 = vmatmul.bf16.gmra.mxu3 %v2368_v27 }
 0x2ea   :  { %1272 = vmatpush.bf16.msrb.mxu0 %v1178_v30 }
 0x2ee   :  { %1273 = vmatpush.bf16.msrb.mxu0 %v1177_v19 }
 0x2f2   :  { %1274 = vmatpush.bf16.msrb.mxu0 %v1176_v36 }
 0x2f6   :  { %1275 = vmatpush.bf16.msrb.mxu0 %v1175_v24 }
 0x2f9   :  { %1226 = vmatmul.bf16.gmra.mxu3 %v2374_v33 }
 0x2fa   :  { %1276 = vmatpush.bf16.msrb.mxu0 %v1174_v25 }
 0x2fe   :  { %1277 = vmatpush.bf16.msrb.mxu0 %v1173_v35 }
 0x302   :  { %1278 = vmatpush.bf16.msrb.mxu0 %v1172_v55 }
 0x306   :  { %1279 = vmatpush.bf16.msrb.mxu0 %v1171_v44 }
 0x309   :  { %1280 = vmatmul.bf16.vlgmr.msrb.gmra.mxu0 %v2380_v39  ;;  %1231 = vmatmul.bf16.gmra.mxu3 %v2407_v63 }
 0x30c   :  { %v1192_v10 = vpop.f32.mrf.mxu3 }
 0x314   :  { %v1194_v17 = vpop.f32.mrf.mxu3 }
 0x319   :  { %1285 = vmatmul.bf16.gmra.mxu0 %v2386_v45  ;;  %1236 = vmatmul.bf16.gmra.mxu3 %v2420_v9  ;;  %v1193_v45 = vadd.f32 %v2713_v42, %v1192_v10 }
 0x31c   :  { %v1197_v27 = vpop.f32.mrf.mxu3 }
 0x324   :  { %v1199_v33 = vpop.f32.mrf.mxu3 }
 0x329   :  { %1290 = vmatmul.bf16.gmra.mxu0 %v2389_v48  ;;  %1241 = vmatmul.bf16.gmra.mxu3 %v2430_v20 }
 0x32c   :  { %v1202_v39 = vpop.f32.mrf.mxu3 }
 0x32d   :  { %v1203_v6 = vadd.f32 %v2713_v42, %v1202_v39 }
 0x334   :  { %v1204_v48 = vpop.f32.mrf.mxu3 }
 0x339   :  { %1295 = vmatmul.bf16.gmra.mxu0 %v2392_v51  ;;  %1246 = vmatmul.bf16.gmra.mxu3 %v2438_v34 }
 0x33c   :  { %v1207_v63 = vpop.f32.mrf.mxu3 }
 0x33d   :  { %v1208_v2 = vadd.f32 %v2713_v42, %v1207_v63 }
 0x344   :  { %v1209_v20 = vpop.f32.mrf.mxu3 }
 0x349   :  { %1300 = vmatmul.bf16.gmra.mxu0 %v2395_v54  ;;  %1251 = vmatmul.bf16.gmra.mxu3 %v2445_v52 }
 0x359   :  { %1305 = vmatmul.bf16.gmra.mxu0 %v2402_v59  ;;  %1256 = vmatmul.bf16.gmra.mxu3 %v2452_v16  ;;  %v1195_v59 = vadd.f32 %v2713_v42, %v1194_v17  ;;  %v1212_v16 = vpop.f32.mrf.mxu3 }
 0x35a   :  { %v1213_v49 = vadd.f32 %v2713_v42, %v1212_v16 }
 0x361   :  { %v1214_v31 = vpop.f32.mrf.mxu3 }
 0x369   :  { %1310 = vmatmul.bf16.gmra.mxu0 %v2412_v3  ;;  %1261 = vmatmul.bf16.gmra.mxu3 %v2460_v37  ;;  %v1217_v15 = vpop.f32.mrf.mxu3 }
 0x36a   :  { %v1218_v23 = vadd.f32 %v2713_v42, %v1217_v15 }
 0x371   :  { %v1219_v11 = vpop.f32.mrf.mxu3 }
 0x372   :  { %v1220_v29 = vadd.f32 %v2713_v42, %v1219_v11 }
 0x379   :  { %1315 = vmatmul.bf16.gmra.mxu0 %v2425_v14  ;;  %v1198_v14 = vadd.f32 %v2713_v42, %v1197_v27  ;;  %1266 = vmatmul.bf16.gmra.mxu3 %v2469_v58  ;;  %v1222_v18 = vpop.f32.mrf.mxu3  ;;  %v3032_v27 = vld [vmem:[#allocation8_spill] sm:$0xff] }
 0x37a   :  { %v1223_v53 = vadd.f32 %v2713_v42, %v1222_v18 }
 0x381   :  { %v1224_v60 = vpop.f32.mrf.mxu3 }
 0x386   :  { %v1281_v51 = vpop.f32.mrf.mxu0 }
 0x387   :  { %v2717_v54 = vadd.f32 %v1281_v51, %v1193_v45 }
 0x389   :  { %1320 = vmatmul.bf16.gmra.mxu0 %v2435_v26  ;;  %1361 = vmax.xlane.f32.xlu2 %v2717_v54  ;;  %v1200_v26 = vadd.f32 %v2713_v42, %v1199_v33  ;;  %v1227_v35 = vpop.f32.mrf.mxu3 }
 0x38a   :  { %v1228_v36 = vadd.f32 %v2713_v42, %v1227_v35 }
 0x38e   :  { %v1283_v3 = vpop.f32.mrf.mxu0 }
 0x38f   :  { %v2722_v9 = vadd.f32 %v1283_v3, %v1195_v59 }
 0x391   :  { %1363 = vmax.xlane.f32.xlu0 %v2722_v9 }
 0x396   :  { %v1286_v34 = vpop.f32.mrf.mxu0 }
 0x397   :  { %v2727_v52 = vadd.f32 %v1286_v34, %v1198_v14 }
 0x399   :  { %1325 = vmatmul.bf16.gmra.mxu0 %v2441_v43  ;;  %1365 = vmax.xlane.f32.xlu1 %v2727_v52  ;;  %v1205_v43 = vadd.f32 %v2713_v42, %v1204_v48 }
 0x39e   :  { %v1288_v37 = vpop.f32.mrf.mxu0 }
 0x39f   :  { %v2732_v21 = vadd.f32 %v1288_v37, %v1200_v26 }
 0x3a1   :  { %1367 = vmax.xlane.f32.xlu2 %v2732_v21 }
 0x3a6   :  { %v1291_v61 = vpop.f32.mrf.mxu0 }
 0x3a7   :  { %v2736_v58 = vadd.f32 %v1291_v61, %v1203_v6 }
 0x3a9   :  { %1330 = vmatmul.bf16.gmra.mxu0 %v2448_v1  ;;  %1369 = vmax.xlane.f32.xlu2 %v2736_v58  ;;  %v1210_v1 = vadd.f32 %v2713_v42, %v1209_v20 }
 0x3ae   :  { %v1293_v50 = vpop.f32.mrf.mxu0 }
 0x3af   :  { %v2741_v40 = vadd.f32 %v1293_v50, %v1205_v43 }
 0x3b1   :  { %1371 = vmax.xlane.f32.xlu0 %v2741_v40 }
 0x3b6   :  { %v1296_v0 = vpop.f32.mrf.mxu0 }
 0x3b7   :  { %v2745_v44 = vadd.f32 %v1296_v0, %v1208_v2 }
 0x3b9   :  { %1335 = vmatmul.bf16.gmra.mxu0 %v2456_v28  ;;  %1373 = vmax.xlane.f32.xlu1 %v2745_v44  ;;  %v1215_v28 = vadd.f32 %v2713_v42, %v1214_v31 }
 0x3be   :  { %v1298_v41 = vpop.f32.mrf.mxu0 }
 0x3bf   :  { %v2750_v5 = vadd.f32 %v1298_v41, %v1210_v1 }
 0x3c1   :  { %1375 = vmax.xlane.f32.xlu2 %v2750_v5 }
 0x3c6   :  { %v1301_v4 = vpop.f32.mrf.mxu0 }
 0x3c7   :  { %v2754_v55 = vadd.f32 %v1301_v4, %v1213_v49 }
 0x3c9   :  { %1340 = vmatmul.bf16.gmra.mxu0 %v2465_v47  ;;  %1377 = vmax.xlane.f32.xlu0 %v2754_v55  ;;  %v1229_v47 = vpop.f32.mrf.mxu3 }
 0x3ca   :  { %v1230_v33 = vadd.f32 %v2713_v42, %v1229_v47 }
 0x3ce   :  { %v1303_v56 = vpop.f32.mrf.mxu0 }
 0x3cf   :  { %v2759_v8 = vadd.f32 %v1303_v56, %v1215_v28 }
 0x3d1   :  { %1379 = vmax.xlane.f32.xlu1 %v2759_v8  ;;  %v1232_v57 = vpop.f32.mrf.mxu3 }
 0x3d2   :  { %v1233_v63 = vadd.f32 %v2713_v42, %v1232_v57 }
 0x3d6   :  { %v1306_v38 = vpop.f32.mrf.mxu0 }
 0x3d7   :  { %v2763_v25 = vadd.f32 %v1306_v38, %v1218_v23 }
 0x3d9   :  { %1345 = vmatmul.bf16.gmra.mxu0 %v2481_v12  ;;  %1381 = vmax.xlane.f32.xlu2 %v2763_v25  ;;  %v1225_v12 = vadd.f32 %v2713_v42, %v1224_v60  ;;  %v1234_v30 = vpop.f32.mrf.mxu3 }
 0x3da   :  { %v1235_v6 = vadd.f32 %v2713_v42, %v1234_v30 }
 0x3de   :  { %v1308_v46 = vpop.f32.mrf.mxu0 }
 0x3df   :  { %v2768_v62 = vadd.f32 %v1308_v46, %v1220_v29 }
 0x3e1   :  { %1383 = vmax.xlane.f32.xlu0 %v2768_v62  ;;  %v1237_v17 = vpop.f32.mrf.mxu3 }
 0x3e2   :  { %v1238_v50 = vadd.f32 %v2713_v42, %v1237_v17 }
 0x3e6   :  { %v1311_v22 = vpop.f32.mrf.mxu0 }
 0x3e7   :  { %v2772_v7 = vadd.f32 %v1311_v22, %v1223_v53 }
 0x3e9   :  { %1350 = vmatmul.bf16.gmra.mxu0 %v2501_v32  ;;  %1385 = vmax.xlane.f32.xlu1 %v2772_v7  ;;  %v1239_v59 = vpop.f32.mrf.mxu3 }
 0x3ea   :  { %v1240_v4 = vadd.f32 %v2713_v42, %v1239_v59 }
 0x3ee   :  { %v1313_v13 = vpop.f32.mrf.mxu0 }
 0x3ef   :  { %v2777_v19 = vadd.f32 %v1313_v13, %v1225_v12 }
 0x3f1   :  { %1387 = vmax.xlane.f32.xlu2 %v2777_v19  ;;  %v1242_v37 = vpop.f32.mrf.mxu3 }
 0x3f2   :  { %v1243_v38 = vadd.f32 %v2713_v42, %v1242_v37 }
 0x3f6   :  { %v1316_v24 = vpop.f32.mrf.mxu0 }
 0x3f7   :  { %v2781_v10 = vadd.f32 %v1316_v24, %v1228_v36 }
 0x3f9   :  { %1355 = vmatmul.bf16.gmra.mxu0 %v3032_v27  ;;  %1389 = vmax.xlane.f32.xlu0 %v2781_v10  ;;  %v1244_v1 = vpop.f32.mrf.mxu3 }
 0x3fa   :  { %v1245_v13 = vadd.f32 %v2713_v42, %v1244_v1 }
 0x3fc   :  { %v1362_v32 = vpop.xlane.xlu2 %1361 }
 0x3fd   :  { %v2787_v39 = vsub.f32 %v2717_v54, %v1362_v32 }
 0x3fe   :  { %v1318_v45 = vpop.f32.mrf.mxu0 }
 0x3ff   :  { %v1457_v48 = vmul.f32 1.442695, %v2787_v39  ;;  %v2790_v51 = vadd.f32 %v1318_v45, %v1230_v33 }
 0x401   :  { %2084 = vpow2.f32 %v1457_v48  ;;  %1391 = vmax.xlane.f32.xlu1 %v2790_v51  ;;  %v1247_v23 = vpop.f32.mrf.mxu3 }
 0x402   :  { %v1248_v27 = vadd.f32 %v2713_v42, %v1247_v23 }
 0x404   :  { %v1364_v3 = vpop.xlane.xlu0 %1363 }
 0x405   :  { %v2795_v14 = vsub.f32 %v2722_v9, %v1364_v3 }
 0x406   :  { %v1321_v20 = vpop.f32.mrf.mxu0 }
 0x407   :  { %v2085_v34 = vpop.eup %2084  ;;  %v1459_v54 = vmul.f32 1.442695, %v2795_v14  ;;  %v2798_v26 = vadd.f32 %v1321_v20, %v1233_v63 }
 0x408   :  { %1521 = vadd.xlane.f32.xlu0 %v2085_v34 }
 0x409   :  { %2086 = vpow2.f32 %v1459_v54  ;;  %1393 = vmax.xlane.f32.xlu2 %v2798_v26  ;;  %v1249_v22 = vpop.f32.mrf.mxu3 }
 0x40a   :  { %v1250_v20 = vadd.f32 %v2713_v42, %v1249_v22 }
 0x40c   :  { %v1366_v16 = vpop.xlane.xlu1 %1365 }
 0x40d   :  { %v2803_v31 = vsub.f32 %v2727_v52, %v1366_v16 }
 0x40e   :  { %v1323_v61 = vpop.f32.mrf.mxu0 }
 0x40f   :  { %v2087_v9 = vpop.eup %2086  ;;  %v1461_v43 = vmul.f32 1.442695, %v2803_v31  ;;  %v2806_v15 = vadd.f32 %v1323_v61, %v1235_v6 }
 0x410   :  { %1523 = vadd.xlane.f32.xlu1 %v2087_v9 }
 0x411   :  { %2088 = vpow2.f32 %v1461_v43  ;;  %1395 = vmax.xlane.f32.xlu0 %v2806_v15  ;;  %v1252_v33 = vpop.f32.mrf.mxu3 }
 0x412   :  { %v1253_v61 = vadd.f32 %v2713_v42, %v1252_v33 }
 0x414   :  { %v1368_v2 = vpop.xlane.xlu2 %1367 }
 0x415   :  { %v2811_v11 = vsub.f32 %v2732_v21, %v1368_v2 }
 0x416   :  { %v1326_v0 = vpop.f32.mrf.mxu0 }
 0x417   :  { %v2089_v52 = vpop.eup %2088  ;;  %v1463_v18 = vmul.f32 1.442695, %v2811_v11  ;;  %v2814_v41 = vadd.f32 %v1326_v0, %v1238_v50 }
 0x418   :  { %1525 = vadd.xlane.f32.xlu2 %v2089_v52 }
 0x419   :  { %2090 = vpow2.f32 %v1463_v18  ;;  %1397 = vmax.xlane.f32.xlu1 %v2814_v41  ;;  %v1254_v16 = vpop.f32.mrf.mxu3 }
 0x41a   :  { %v1255_v18 = vadd.f32 %v2713_v42, %v1254_v16 }
 0x41c   :  { %v1370_v49 = vpop.xlane.xlu2 %1369 }
 0x41d   :  { %v2819_v60 = vsub.f32 %v2736_v58, %v1370_v49 }
 0x41e   :  { %v1328_v28 = vpop.f32.mrf.mxu0 }
 0x41f   :  { %v2091_v21 = vpop.eup %2090  ;;  %v1465_v56 = vmul.f32 1.442695, %v2819_v60  ;;  %v2822_v35 = vadd.f32 %v1328_v28, %v1240_v4 }
 0x420   :  { %1527 = vadd.xlane.f32.xlu0 %v2091_v21 }
 0x421   :  { %2092 = vpow2.f32 %v1465_v56  ;;  %1399 = vmax.xlane.f32.xlu2 %v2822_v35  ;;  %v1257_v1 = vpop.f32.mrf.mxu3 }
 0x422   :  { %v1258_v23 = vadd.f32 %v2713_v42, %v1257_v1 }
 0x424   :  { %v1372_v47 = vpop.xlane.xlu0 %1371 }
 0x425   :  { %v2827_v29 = vsub.f32 %v2741_v40, %v1372_v47 }
 0x426   :  { %v1331_v46 = vpop.f32.mrf.mxu0 }
 0x427   :  { %v2093_v58 = vpop.eup %2092  ;;  %v1467_v53 = vmul.f32 1.442695, %v2827_v29  ;;  %v2830_v57 = vadd.f32 %v1331_v46, %v1243_v38 }
 0x428   :  { %1529 = vadd.xlane.f32.xlu1 %v2093_v58 }
 0x429   :  { %2094 = vpow2.f32 %v1467_v53  ;;  %1401 = vmax.xlane.f32.xlu0 %v2830_v57  ;;  %v1259_v56 = vpop.f32.mrf.mxu3 }
 0x42a   :  { %v1260_v58 = vadd.f32 %v2713_v42, %v1259_v56 }
 0x42c   :  { %v1374_v12 = vpop.xlane.xlu1 %1373 }
 0x42d   :  { %v2835_v30 = vsub.f32 %v2745_v44, %v1374_v12 }
 0x42e   :  { %v1333_v36 = vpop.f32.mrf.mxu0 }
 0x42f   :  { %v2095_v40 = vpop.eup %2094  ;;  %v1469_v24 = vmul.f32 1.442695, %v2835_v30  ;;  %v2838_v17 = vadd.f32 %v1333_v36, %v1245_v13 }
 0x430   :  { %1531 = vadd.xlane.f32.xlu2 %v2095_v40 }
 0x431   :  { %2096 = vpow2.f32 %v1469_v24  ;;  %1403 = vmax.xlane.f32.xlu1 %v2838_v17 }
 0x434   :  { %v1376_v32 = vpop.xlane.xlu2 %1375 }
 0x435   :  { %v2843_v45 = vsub.f32 %v2750_v5, %v1376_v32 }
 0x436   :  { %v1336_v48 = vpop.f32.mrf.mxu0 }
 0x437   :  { %v2097_v44 = vpop.eup %2096  ;;  %v1471_v59 = vmul.f32 1.442695, %v2843_v45  ;;  %v2846_v63 = vadd.f32 %v1336_v48, %v1248_v27 }
 0x438   :  { %1533 = vadd.xlane.f32.xlu0 %v2097_v44 }
 0x439   :  { %2098 = vpow2.f32 %v1471_v59  ;;  %1405 = vmax.xlane.f32.xlu2 %v2846_v63 }
 0x43c   :  { %v1378_v3 = vpop.xlane.xlu0 %1377 }
 0x43d   :  { %v2851_v34 = vsub.f32 %v2754_v55, %v1378_v3 }
 0x43e   :  { %v1338_v54 = vpop.f32.mrf.mxu0 }
 0x43f   :  { %v2099_v5 = vpop.eup %2098  ;;  %v1473_v37 = vmul.f32 1.442695, %v2851_v34  ;;  %v2854_v6 = vadd.f32 %v1338_v54, %v1250_v20 }
 0x440   :  { %1535 = vadd.xlane.f32.xlu1 %v2099_v5 }
 0x441   :  { %2100 = vpow2.f32 %v1473_v37  ;;  %1407 = vmax.xlane.f32.xlu0 %v2854_v6 }
 0x444   :  { %v1380_v9 = vpop.xlane.xlu1 %1379 }
 0x445   :  { %v2859_v43 = vsub.f32 %v2759_v8, %v1380_v9 }
 0x446   :  { %v1341_v50 = vpop.f32.mrf.mxu0 }
 0x447   :  { %v2101_v55 = vpop.eup %2100  ;;  %v1475_v2 = vmul.f32 1.442695, %v2859_v43  ;;  %v2862_v0 = vadd.f32 %v1341_v50, %v1253_v61 }
 0x448   :  { %1537 = vadd.xlane.f32.xlu2 %v2101_v55 }
 0x449   :  { %2102 = vpow2.f32 %v1475_v2  ;;  %1409 = vmax.xlane.f32.xlu1 %v2862_v0 }
 0x44c   :  { %v1382_v52 = vpop.xlane.xlu2 %1381 }
 0x44d   :  { %v2867_v49 = vsub.f32 %v2763_v25, %v1382_v52  ;;  %v1262_v25 = vpop.f32.mrf.mxu3 }
 0x44e   :  { %v1343_v4 = vpop.f32.mrf.mxu0  ;;  %v1263_v12 = vadd.f32 %v2713_v42, %v1262_v25 }
 0x44f   :  { %v2103_v8 = vpop.eup %2102  ;;  %v1477_v28 = vmul.f32 1.442695, %v2867_v49  ;;  %v2870_v21 = vadd.f32 %v1343_v4, %v1255_v18 }
 0x450   :  { %1539 = vadd.xlane.f32.xlu0 %v2103_v8 }
 0x451   :  { %2104 = vpow2.f32 %v1477_v28  ;;  %1411 = vmax.xlane.f32.xlu2 %v2870_v21 }
 0x454   :  { %v1384_v32 = vpop.xlane.xlu0 %1383 }
 0x455   :  { %v1264_v36 = vpop.f32.mrf.mxu3 }
 0x456   :  { %v1346_v38 = vpop.f32.mrf.mxu0  ;;  %v1265_v33 = vadd.f32 %v2713_v42, %v1264_v36 }
 0x457   :  { %v2105_v47 = vpop.eup %2104  ;;  %v2874_v46 = vadd.f32 %v1346_v38, %v1258_v23 }
 0x458   :  { %1541 = vadd.xlane.f32.xlu1 %v2105_v47 }
 0x459   :  { %1413 = vmax.xlane.f32.xlu0 %v2874_v46 }
 0x45c   :  { %v1386_v40 = vpop.xlane.xlu1 %1385 }
 0x45d   :  { %v2886_v27 = vsub.f32 %v2772_v7, %v1386_v40  ;;  %v1267_v20 = vpop.f32.mrf.mxu3 }
 0x45e   :  { %v1348_v53 = vpop.f32.mrf.mxu0  ;;  %v1268_v7 = vadd.f32 %v2713_v42, %v1267_v20 }
 0x45f   :  { %v2878_v22 = vadd.f32 %v1348_v53, %v1260_v58  ;;  %v1481_v48 = vmul.f32 1.442695, %v2886_v27 }
 0x461   :  { %1415 = vmax.xlane.f32.xlu1 %v2878_v22  ;;  %2106 = vpow2.f32 %v1481_v48 }
 0x464   :  { %v1388_v3 = vpop.xlane.xlu2 %1387 }
 0x465   :  { %v2894_v54 = vsub.f32 %v2777_v19, %v1388_v3  ;;  %v2906_v19 = vsub.f32 %v2768_v62, %v1384_v32  ;;  %v1269_v1 = vpop.f32.mrf.mxu3 }
 0x466   :  { %v1351_v13 = vpop.f32.mrf.mxu0  ;;  %v1270_v18 = vadd.f32 %v2713_v42, %v1269_v1 }
 0x467   :  { %v2882_v24 = vadd.f32 %v1351_v13, %v1263_v12  ;;  %v1483_v9 = vmul.f32 1.442695, %v2894_v54  ;;  %v2107_v2 = vpop.eup %2106  ;;  %v1479_v8 = vmul.f32 1.442695, %v2906_v19 }
 0x469   :  { %1417 = vmax.xlane.f32.xlu2 %v2882_v24 }
 0x46c   :  { %v1390_v16 = vpop.xlane.xlu0 %1389 }
 0x46d   :  { %v2918_v42 = vsub.f32 %v2781_v10, %v1390_v16 }
 0x46e   :  { %v1353_v44 = vpop.f32.mrf.mxu0 }
 0x46f   :  { %v2890_v59 = vadd.f32 %v1353_v44, %v1265_v33  ;;  %v1485_v53 = vmul.f32 1.442695, %v2918_v42 }
 0x471   :  { %1419 = vmax.xlane.f32.xlu0 %v2890_v59 }
 0x474   :  { %v1392_v5 = vpop.xlane.xlu1 %1391 }
 0x475   :  { %v2898_v37 = vsub.f32 %v2790_v51, %v1392_v5 }
 0x476   :  { %v1356_v61 = vpop.f32.mrf.mxu0 }
 0x477   :  { %v1487_v50 = vmul.f32 1.442695, %v2898_v37  ;;  %v2902_v55 = vadd.f32 %v1356_v61, %v1268_v7 }
 0x479   :  { %2108 = vpow2.f32 %v1487_v50  ;;  %1545 = vadd.xlane.f32.xlu0 %v2107_v2  ;;  %1421 = vmax.xlane.f32.xlu1 %v2902_v55 }
 0x47a   :  { %2110 = vpow2.f32 %v1483_v9 }
 0x47b   :  { %v1522_v52 = vpop.xlane.xlu0 %1521 }
 0x47c   :  { %2112 = vlog2.f32 %v1522_v52  ;;  %v1394_v51 = vpop.xlane.xlu2 %1393 }
 0x47d   :  { %v2910_v4 = vsub.f32 %v2798_v26, %v1394_v51 }
 0x47e   :  { %v1358_v28 = vpop.f32.mrf.mxu0 }
 0x47f   :  { %v2109_v56 = vpop.eup %2108  ;;  %v1489_v23 = vmul.f32 1.442695, %v2910_v4  ;;  %v2914_v38 = vadd.f32 %v1358_v28, %v1270_v18 }
 0x480   :  { %v2111_v62 = vpop.eup %2110 }
 0x481   :  { %2114 = vpow2.f32 %v1489_v23  ;;  %1423 = vmax.xlane.f32.xlu2 %v2914_v38  ;;  %1551 = vadd.xlane.f32.xlu0 %v2109_v56 }
 0x482   :  { %v2113_v47 = vpop.eup %2112  ;;  %2116 = vpow2.f32 %v1479_v8  ;;  %1547 = vadd.xlane.f32.xlu1 %v2111_v62 }
 0x483   :  { %v1586_v26 = vmul.f32 0.6931472, %v2113_v47  ;;  %v1524_v25 = vpop.xlane.xlu1 %1523 }
 0x484   :  { %2118 = vlog2.f32 %v1524_v25  ;;  %v1396_v13 = vpop.xlane.xlu0 %1395 }
 0x485   :  { %v1649_v58 = vsub.f32 %v2787_v39, %v1586_v26  ;;  %2120 = vpow2.f32 %v1485_v53  ;;  %v2923_v32 = vsub.f32 %v2806_v15, %v1396_v13 }
 0x487   :  { %v2115_v12 = vpop.eup %2114  ;;  %1681 = vst [vmem:[#allocation5] sm:$0xff] %v1649_v58  ;;  %v1491_v3 = vmul.f32 1.442695, %v2923_v32 }
 0x488   :  { %v2117_v36 = vpop.eup %2116 }
 0x489   :  { %1543 = vadd.xlane.f32.xlu2 %v2117_v36 }
 0x48a   :  { %v2119_v40 = vpop.eup %2118  ;;  %1553 = vadd.xlane.f32.xlu1 %v2115_v12 }
 0x48b   :  { %v1588_v10 = vmul.f32 0.6931472, %v2119_v40  ;;  %v1526_v33 = vpop.xlane.xlu2 %1525  ;;  %v2121_v16 = vpop.eup %2120 }
 0x48c   :  { %2122 = vlog2.f32 %v1526_v33  ;;  %v1398_v48 = vpop.xlane.xlu1 %1397 }
 0x48d   :  { %v1650_v44 = vsub.f32 %v2795_v14, %v1588_v10  ;;  %v2927_v39 = vsub.f32 %v2814_v41, %v1398_v48 }
 0x48f   :  { %1682 = vst [vmem:[#allocation5 + $0x8] sm:$0xff] %v1650_v44  ;;  %v1493_v20 = vmul.f32 1.442695, %v2927_v39 }
 0x491   :  { %2124 = vpow2.f32 %v1493_v20  ;;  %1549 = vadd.xlane.f32.xlu2 %v2121_v16 }
 0x492   :  { %v2123_v15 = vpop.eup %2122  ;;  %2126 = vpow2.f32 %v1491_v3 }
 0x493   :  { %v1590_v7 = vmul.f32 0.6931472, %v2123_v15  ;;  %v1528_v5 = vpop.xlane.xlu0 %1527 }
 0x494   :  { %2128 = vlog2.f32 %v1528_v5  ;;  %v1400_v61 = vpop.xlane.xlu2 %1399 }
 0x495   :  { %v1651_v9 = vsub.f32 %v2803_v31, %v1590_v7  ;;  %v2933_v14 = vsub.f32 %v2822_v35, %v1400_v61 }
 0x497   :  { %v2125_v41 = vpop.eup %2124  ;;  %1683 = vst [vmem:[#allocation5 + $0x10] sm:$0xff] %v1651_v9  ;;  %v1495_v50 = vmul.f32 1.442695, %v2933_v14 }
 0x498   :  { %v2127_v2 = vpop.eup %2126  ;;  %1557 = vadd.xlane.f32.xlu0 %v2125_v41 }
 0x499   :  { %2130 = vpow2.f32 %v1495_v50  ;;  %1555 = vadd.xlane.f32.xlu2 %v2127_v2 }
 0x49a   :  { %v2129_v1 = vpop.eup %2128 }
 0x49b   :  { %v1592_v52 = vmul.f32 0.6931472, %v2129_v1  ;;  %v1530_v51 = vpop.xlane.xlu1 %1529 }
 0x49c   :  { %2132 = vlog2.f32 %v1530_v51  ;;  %v1402_v18 = vpop.xlane.xlu0 %1401 }
 0x49d   :  { %v1652_v8 = vsub.f32 %v2811_v11, %v1592_v52  ;;  %v2938_v31 = vsub.f32 %v2830_v57, %v1402_v18 }
 0x49f   :  { %v2131_v35 = vpop.eup %2130  ;;  %1684 = vst [vmem:[#allocation5 + $0x18] sm:$0xff] %v1652_v8  ;;  %v1497_v28 = vmul.f32 1.442695, %v2938_v31 }
 0x4a0   :  { %1559 = vadd.xlane.f32.xlu1 %v2131_v35 }
 0x4a1   :  { %2134 = vpow2.f32 %v1497_v28 }
 0x4a2   :  { %v2133_v56 = vpop.eup %2132 }
 0x4a3   :  { %v1594_v23 = vmul.f32 0.6931472, %v2133_v56  ;;  %v1532_v62 = vpop.xlane.xlu2 %1531 }
 0x4a4   :  { %2136 = vlog2.f32 %v1532_v62  ;;  %v1404_v47 = vpop.xlane.xlu1 %1403 }
 0x4a5   :  { %v1653_v26 = vsub.f32 %v2819_v60, %v1594_v23  ;;  %v2943_v25 = vsub.f32 %v2838_v17, %v1404_v47 }
 0x4a7   :  { %v2135_v11 = vpop.eup %2134  ;;  %1685 = vst [vmem:[#allocation5 + $0x20] sm:$0xff] %v1653_v26  ;;  %v1499_v57 = vmul.f32 1.442695, %v2943_v25 }
 0x4a8   :  { %1561 = vadd.xlane.f32.xlu2 %v2135_v11 }
 0x4a9   :  { %2138 = vpow2.f32 %v1499_v57 }
 0x4aa   :  { %v2137_v58 = vpop.eup %2136 }
 0x4ab   :  { %v1596_v53 = vmul.f32 0.6931472, %v2137_v58  ;;  %v1534_v12 = vpop.xlane.xlu0 %1533 }
 0x4ac   :  { %2140 = vlog2.f32 %v1534_v12  ;;  %v1406_v13 = vpop.xlane.xlu2 %1405 }
 0x4ad   :  { %v1654_v36 = vsub.f32 %v2827_v29, %v1596_v53  ;;  %v2948_v40 = vsub.f32 %v2846_v63, %v1406_v13 }
 0x4af   :  { %v2139_v60 = vpop.eup %2138  ;;  %1686 = vst [vmem:[#allocation5 + $0x28] sm:$0xff] %v1654_v36  ;;  %v1501_v17 = vmul.f32 1.442695, %v2948_v40 }
 0x4b0   :  { %1563 = vadd.xlane.f32.xlu0 %v2139_v60 }
 0x4b1   :  { %2142 = vpow2.f32 %v1501_v17 }
 0x4b2   :  { %v2141_v10 = vpop.eup %2140 }
 0x4b3   :  { %v1598_v33 = vmul.f32 0.6931472, %v2141_v10  ;;  %v1536_v48 = vpop.xlane.xlu1 %1535 }
 0x4b4   :  { %2144 = vlog2.f32 %v1536_v48  ;;  %v1408_v44 = vpop.xlane.xlu0 %1407 }
 0x4b5   :  { %v1655_v3 = vsub.f32 %v2835_v30, %v1598_v33  ;;  %v2953_v20 = vsub.f32 %v2854_v6, %v1408_v44 }
 0x4b7   :  { %v2143_v29 = vpop.eup %2142  ;;  %1687 = vst [vmem:[#allocation5 + $0x30] sm:$0xff] %v1655_v3  ;;  %v1503_v63 = vmul.f32 1.442695, %v2953_v20 }
 0x4b8   :  { %1565 = vadd.xlane.f32.xlu1 %v2143_v29 }
 0x4b9   :  { %2146 = vpow2.f32 %v1503_v63 }
 0x4ba   :  { %v2145_v16 = vpop.eup %2144 }
 0x4bb   :  { %v1600_v15 = vmul.f32 0.6931472, %v2145_v16  ;;  %v1538_v7 = vpop.xlane.xlu2 %1537 }
 0x4bc   :  { %2148 = vlog2.f32 %v1538_v7  ;;  %v1410_v5 = vpop.xlane.xlu1 %1409 }
 0x4bd   :  { %v1656_v61 = vsub.f32 %v2843_v45, %v1600_v15  ;;  %v2958_v9 = vsub.f32 %v2862_v0, %v1410_v5 }
 0x4bf   :  { %v2147_v30 = vpop.eup %2146  ;;  %1688 = vst [vmem:[#allocation5 + $0x38] sm:$0xff] %v1656_v61  ;;  %v1505_v6 = vmul.f32 1.442695, %v2958_v9 }
 0x4c0   :  { %1567 = vadd.xlane.f32.xlu2 %v2147_v30 }
 0x4c1   :  { %2150 = vpow2.f32 %v1505_v6 }
 0x4c2   :  { %v2149_v41 = vpop.eup %2148 }
 0x4c3   :  { %v1602_v50 = vmul.f32 0.6931472, %v2149_v41  ;;  %v1540_v2 = vpop.xlane.xlu0 %1539 }
 0x4c4   :  { %2152 = vlog2.f32 %v1540_v2  ;;  %v1412_v1 = vpop.xlane.xlu2 %1411 }
 0x4c5   :  { %v1657_v52 = vsub.f32 %v2851_v34, %v1602_v50  ;;  %v2963_v51 = vsub.f32 %v2870_v21, %v1412_v1 }
 0x4c7   :  { %v2151_v45 = vpop.eup %2150  ;;  %1689 = vst [vmem:[#allocation5 + $0x40] sm:$0xff] %v1657_v52  ;;  %v1507_v0 = vmul.f32 1.442695, %v2963_v51 }
 0x4c8   :  { %1569 = vadd.xlane.f32.xlu0 %v2151_v45 }
 0x4c9   :  { %2154 = vpow2.f32 %v1507_v0 }
 0x4ca   :  { %v2153_v18 = vpop.eup %2152 }
 0x4cb   :  { %v1604_v8 = vmul.f32 0.6931472, %v2153_v18  ;;  %v1542_v35 = vpop.xlane.xlu1 %1541 }
 0x4cc   :  { %2156 = vlog2.f32 %v1542_v35  ;;  %v1414_v28 = vpop.xlane.xlu0 %1413 }
 0x4cd   :  { %v1658_v56 = vsub.f32 %v2859_v43, %v1604_v8  ;;  %v2968_v23 = vsub.f32 %v2874_v46, %v1414_v28 }
 0x4cf   :  { %v2155_v34 = vpop.eup %2154  ;;  %1690 = vst [vmem:[#allocation5 + $0x48] sm:$0xff] %v1658_v56  ;;  %v1509_v21 = vmul.f32 1.442695, %v2968_v23 }
 0x4d0   :  { %1571 = vadd.xlane.f32.xlu1 %v2155_v34 }
 0x4d1   :  { %2158 = vpow2.f32 %v1509_v21 }
 0x4d2   :  { %v2157_v62 = vpop.eup %2156 }
 0x4d3   :  { %v1606_v47 = vmul.f32 0.6931472, %v2157_v62 }
 0x4d4   :  { %v1416_v26 = vpop.xlane.xlu1 %1415 }
 0x4d5   :  { %v1659_v11 = vsub.f32 %v2867_v49, %v1606_v47  ;;  %v2973_v57 = vsub.f32 %v2878_v22, %v1416_v26 }
 0x4d7   :  { %v2159_v58 = vpop.eup %2158  ;;  %1691 = vst [vmem:[#allocation5 + $0x50] sm:$0xff] %v1659_v11  ;;  %v1511_v43 = vmul.f32 1.442695, %v2973_v57 }
 0x4d8   :  { %1573 = vadd.xlane.f32.xlu2 %v2159_v58 }
 0x4d9   :  { %2160 = vpow2.f32 %v1511_v43 }
 0x4dc   :  { %v1418_v46 = vpop.xlane.xlu2 %1417 }
 0x4dd   :  { %v2977_v53 = vsub.f32 %v2882_v24, %v1418_v46 }
 0x4df   :  { %v2161_v12 = vpop.eup %2160  ;;  %v1513_v13 = vmul.f32 1.442695, %v2977_v53 }
 0x4e0   :  { %1575 = vadd.xlane.f32.xlu0 %v2161_v12 }
 0x4e1   :  { %2162 = vpow2.f32 %v1513_v13 }
 0x4e4   :  { %v1420_v36 = vpop.xlane.xlu0 %1419 }
 0x4e5   :  { %v2981_v49 = vsub.f32 %v2890_v59, %v1420_v36 }
 0x4e7   :  { %v2163_v22 = vpop.eup %2162  ;;  %v1515_v60 = vmul.f32 1.442695, %v2981_v49 }
 0x4e8   :  { %1577 = vadd.xlane.f32.xlu1 %v2163_v22 }
 0x4e9   :  { %2164 = vpow2.f32 %v1515_v60 }
 0x4ec   :  { %v1546_v17 = vpop.xlane.xlu0 %1545  ;;  %v1422_v10 = vpop.xlane.xlu1 %1421 }
 0x4ed   :  { %2166 = vlog2.f32 %v1546_v17  ;;  %v2985_v24 = vsub.f32 %v2902_v55, %v1422_v10 }
 0x4ef   :  { %v2165_v33 = vpop.eup %2164  ;;  %v1517_v48 = vmul.f32 1.442695, %v2985_v24 }
 0x4f0   :  { %1579 = vadd.xlane.f32.xlu2 %v2165_v33 }
 0x4f1   :  { %2168 = vpow2.f32 %v1517_v48 }
 0x4f3   :  { %v2167_v44 = vpop.eup %2166 }
 0x4f4   :  { %v1610_v3 = vmul.f32 0.6931472, %v2167_v44  ;;  %v1552_v59 = vpop.xlane.xlu0 %1551  ;;  %v1424_v29 = vpop.xlane.xlu2 %1423 }
 0x4f5   :  { %2170 = vlog2.f32 %v1552_v59  ;;  %v1548_v63 = vpop.xlane.xlu1 %1547  ;;  %v2989_v16 = vsub.f32 %v2914_v38, %v1424_v29 }
 0x4f6   :  { %v1661_v15 = vsub.f32 %v2886_v27, %v1610_v3  ;;  %2172 = vlog2.f32 %v1548_v63 }
 0x4f7   :  { %v2169_v7 = vpop.eup %2168  ;;  %v1519_v55 = vmul.f32 1.442695, %v2989_v16 }
 0x4f8   :  { %1693 = vst [vmem:[#allocation5 + $0x60] sm:$0xff] %v1661_v15  ;;  %1581 = vadd.xlane.f32.xlu0 %v2169_v7 }
 0x4f9   :  { %2174 = vpow2.f32 %v1519_v55 }
 0x4fb   :  { %v2171_v5 = vpop.eup %2170 }
 0x4fc   :  { %v2173_v61 = vpop.eup %2172  ;;  %v1616_v30 = vmul.f32 0.6931472, %v2171_v5  ;;  %v1544_v6 = vpop.xlane.xlu2 %1543 }
 0x4fd   :  { %v1612_v41 = vmul.f32 0.6931472, %v2173_v61  ;;  %v1554_v50 = vpop.xlane.xlu1 %1553  ;;  %2176 = vlog2.f32 %v1544_v6 }
 0x4fe   :  { %v1664_v2 = vsub.f32 %v2898_v37, %v1616_v30  ;;  %2178 = vlog2.f32 %v1554_v50 }
 0x4ff   :  { %v2175_v38 = vpop.eup %2174  ;;  %v1662_v27 = vsub.f32 %v2894_v54, %v1612_v41 }
 0x500   :  { %1696 = vst [vmem:[#allocation5 + $0x78] sm:$0xff] %v1664_v2  ;;  %1583 = vadd.xlane.f32.xlu1 %v2175_v38 }
 0x501   :  { %1694 = vst [vmem:[#allocation5 + $0x68] sm:$0xff] %v1662_v27 }
 0x503   :  { %v2177_v1 = vpop.eup %2176 }
 0x504   :  { %v2179_v52 = vpop.eup %2178  ;;  %v1608_v45 = vmul.f32 0.6931472, %v2177_v1  ;;  %v1550_v0 = vpop.xlane.xlu2 %1549 }
 0x505   :  { %v1618_v18 = vmul.f32 0.6931472, %v2179_v52  ;;  %2180 = vlog2.f32 %v1550_v0 }
 0x506   :  { %v1660_v8 = vsub.f32 %v2906_v19, %v1608_v45 }
 0x507   :  { %v1665_v35 = vsub.f32 %v2910_v4, %v1618_v18 }
 0x508   :  { %1692 = vst [vmem:[#allocation5 + $0x58] sm:$0xff] %v1660_v8 }
 0x509   :  { %1697 = vst [vmem:[#allocation5 + $0x80] sm:$0xff] %v1665_v35 }
 0x50b   :  { %v2181_v37 = vpop.eup %2180  ;;  %v1558_v28 = vpop.xlane.xlu0 %1557 }
 0x50c   :  { %v1614_v56 = vmul.f32 0.6931472, %v2181_v37  ;;  %2182 = vlog2.f32 %v1558_v28  ;;  %v1556_v54 = vpop.xlane.xlu2 %1555 }
 0x50d   :  { %2184 = vlog2.f32 %v1556_v54 }
 0x50e   :  { %v1663_v34 = vsub.f32 %v2918_v42, %v1614_v56 }
 0x510   :  { %1695 = vst [vmem:[#allocation5 + $0x70] sm:$0xff] %v1663_v34 }
 0x512   :  { %v2183_v21 = vpop.eup %2182 }
 0x513   :  { %v2185_v62 = vpop.eup %2184  ;;  %v1622_v47 = vmul.f32 0.6931472, %v2183_v21  ;;  %v1560_v26 = vpop.xlane.xlu1 %1559 }
 0x514   :  { %v1620_v11 = vmul.f32 0.6931472, %v2185_v62  ;;  %2186 = vlog2.f32 %v1560_v26 }
 0x515   :  { %v1667_v19 = vsub.f32 %v2927_v39, %v1622_v47 }
 0x516   :  { %v1666_v4 = vsub.f32 %v2923_v32, %v1620_v11 }
 0x517   :  { %1699 = vst [vmem:[#allocation5 + $0x90] sm:$0xff] %v1667_v19 }
 0x518   :  { %1698 = vst [vmem:[#allocation5 + $0x88] sm:$0xff] %v1666_v4 }
 0x51a   :  { %v2187_v58 = vpop.eup %2186 }
 0x51b   :  { %v1624_v43 = vmul.f32 0.6931472, %v2187_v58  ;;  %v1562_v46 = vpop.xlane.xlu2 %1561 }
 0x51c   :  { %2188 = vlog2.f32 %v1562_v46 }
 0x51d   :  { %v1668_v12 = vsub.f32 %v2933_v14, %v1624_v43 }
 0x51f   :  { %1700 = vst [vmem:[#allocation5 + $0x98] sm:$0xff] %v1668_v12 }
 0x522   :  { %v2189_v42 = vpop.eup %2188 }
 0x523   :  { %v1626_v13 = vmul.f32 0.6931472, %v2189_v42  ;;  %v1564_v36 = vpop.xlane.xlu0 %1563 }
 0x524   :  { %2190 = vlog2.f32 %v1564_v36 }
 0x525   :  { %v1669_v22 = vsub.f32 %v2938_v31, %v1626_v13 }
 0x527   :  { %1701 = vst [vmem:[#allocation5 + $0xa0] sm:$0xff] %v1669_v22 }
 0x52a   :  { %v2191_v60 = vpop.eup %2190 }
 0x52b   :  { %v1628_v39 = vmul.f32 0.6931472, %v2191_v60  ;;  %v1566_v17 = vpop.xlane.xlu1 %1565 }
 0x52c   :  { %2192 = vlog2.f32 %v1566_v17 }
 0x52d   :  { %v1670_v32 = vsub.f32 %v2943_v25, %v1628_v39 }
 0x52f   :  { %1702 = vst [vmem:[#allocation5 + $0xa8] sm:$0xff] %v1670_v32 }
 0x532   :  { %v2193_v10 = vpop.eup %2192 }
 0x533   :  { %v1630_v33 = vmul.f32 0.6931472, %v2193_v10  ;;  %v1568_v48 = vpop.xlane.xlu2 %1567 }
 0x534   :  { %2194 = vlog2.f32 %v1568_v48 }
 0x535   :  { %v1671_v14 = vsub.f32 %v2948_v40, %v1630_v33 }
 0x537   :  { %1703 = vst [vmem:[#allocation5 + $0xb0] sm:$0xff] %v1671_v14 }
 0x53a   :  { %v2195_v44 = vpop.eup %2194 }
 0x53b   :  { %v1632_v3 = vmul.f32 0.6931472, %v2195_v44  ;;  %v1570_v59 = vpop.xlane.xlu0 %1569 }
 0x53c   :  { %2196 = vlog2.f32 %v1570_v59 }
 0x53d   :  { %v1672_v31 = vsub.f32 %v2953_v20, %v1632_v3 }
 0x53f   :  { %1704 = vst [vmem:[#allocation5 + $0xb8] sm:$0xff] %v1672_v31 }
 0x542   :  { %v2197_v29 = vpop.eup %2196 }
 0x543   :  { %v1634_v63 = vmul.f32 0.6931472, %v2197_v29  ;;  %v1572_v15 = vpop.xlane.xlu1 %1571 }
 0x544   :  { %2198 = vlog2.f32 %v1572_v15 }
 0x545   :  { %v1673_v25 = vsub.f32 %v2958_v9, %v1634_v63 }
 0x547   :  { %1705 = vst [vmem:[#allocation5 + $0xc0] sm:$0xff] %v1673_v25 }
 0x54a   :  { %v2199_v7 = vpop.eup %2198 }
 0x54b   :  { %v1636_v55 = vmul.f32 0.6931472, %v2199_v7  ;;  %v1574_v5 = vpop.xlane.xlu2 %1573 }
 0x54c   :  { %2200 = vlog2.f32 %v1574_v5 }
 0x54d   :  { %v1674_v40 = vsub.f32 %v2963_v51, %v1636_v55 }
 0x54f   :  { %1706 = vst [vmem:[#allocation5 + $0xc8] sm:$0xff] %v1674_v40 }
 0x552   :  { %v2201_v61 = vpop.eup %2200 }
 0x553   :  { %v1638_v30 = vmul.f32 0.6931472, %v2201_v61  ;;  %v1576_v6 = vpop.xlane.xlu0 %1575 }
 0x554   :  { %2202 = vlog2.f32 %v1576_v6 }
 0x555   :  { %v1675_v20 = vsub.f32 %v2968_v23, %v1638_v30 }
 0x557   :  { %1707 = vst [vmem:[#allocation5 + $0xd0] sm:$0xff] %v1675_v20 }
 0x55a   :  { %v2203_v41 = vpop.eup %2202 }
 0x55b   :  { %v1640_v50 = vmul.f32 0.6931472, %v2203_v41  ;;  %v1578_v2 = vpop.xlane.xlu1 %1577 }
 0x55c   :  { %2204 = vlog2.f32 %v1578_v2 }
 0x55d   :  { %v1676_v9 = vsub.f32 %v2973_v57, %v1640_v50 }
 0x55f   :  { %1708 = vst [vmem:[#allocation5 + $0xd8] sm:$0xff] %v1676_v9 }
 0x562   :  { %v2205_v38 = vpop.eup %2204 }
 0x563   :  { %v1642_v27 = vmul.f32 0.6931472, %v2205_v38  ;;  %v1580_v1 = vpop.xlane.xlu2 %1579 }
 0x564   :  { %2206 = vlog2.f32 %v1580_v1 }
 0x565   :  { %v1677_v51 = vsub.f32 %v2977_v53, %v1642_v27 }
 0x567   :  { %1709 = vst [vmem:[#allocation5 + $0xe0] sm:$0xff] %v1677_v51 }
 0x56a   :  { %v2207_v52 = vpop.eup %2206 }
 0x56b   :  { %v1644_v45 = vmul.f32 0.6931472, %v2207_v52  ;;  %v1582_v0 = vpop.xlane.xlu0 %1581 }
 0x56c   :  { %2208 = vlog2.f32 %v1582_v0 }
 0x56d   :  { %v1678_v23 = vsub.f32 %v2981_v49, %v1644_v45 }
 0x56f   :  { %1710 = vst [vmem:[#allocation5 + $0xe8] sm:$0xff] %v1678_v23 }
 0x572   :  { %v2209_v18 = vpop.eup %2208 }
 0x573   :  { %v1646_v8 = vmul.f32 0.6931472, %v2209_v18  ;;  %v1584_v35 = vpop.xlane.xlu1 %1583 }
 0x574   :  { %2210 = vlog2.f32 %v1584_v35 }
 0x575   :  { %v1679_v57 = vsub.f32 %v2985_v24, %v1646_v8 }
 0x577   :  { %1711 = vst [vmem:[#allocation5 + $0xf0] sm:$0xff] %v1679_v57 }
 0x57a   :  { %v2211_v37 = vpop.eup %2210 }
 0x57b   :  { %v1648_v53 = vmul.f32 0.6931472, %v2211_v37 }
 0x57d   :  { %v1680_v28 = vsub.f32 %v2989_v16, %v1648_v53 }
 0x57f   :  { %1712 = vst [vmem:[#allocation5 + $0xf8] sm:$0xff] %v1680_v28 }
 0x580   :  { %1725 = dma.vmem_to_hbm [thread:$0]  %s1718_s9, 4096, %s1720_s1, [#allocation4], %s2265_s26, %s2265_s26, %s2266_s27  }
 0x581   :  { %2262 = dma.done.wait [#allocation4], 4096  }
 0x582   :  { %2263 = vsyncadd [#allocation4], 4294963200 }
 0x583   :  { %1730 = vsyncpa [#allocation3], 1 }
 0x584   :  { %1731 = vsyncpa [#allocation4], 1 }

</bundles_post_ra>
